<compile_context>
chip_gen: v5e
topology: v5e:2x2
jax: 0.10.0
libtpu: 0.0.40
codegen_flags: <defaults>
</compile_context>

<pallas_src>
import functools

import jax
import jax.numpy as jnp
from jax.experimental import pallas as pl
from jax.experimental.pallas import tpu as pltpu

HIDDEN1 = 500        # original PyTorch hidden width
HIDDEN1_PAD = 512    # padded to a multiple of 128
HIDDEN2 = 256


def _round_up(x, m):
    return ((x + m - 1) // m) * m


# ----------------------------------------------------------------------------
# Pallas kernel: fused encoder + decoder over one batch tile.
# ----------------------------------------------------------------------------
def _autoencoder_kernel(x_ref,
                        w1_ref, b1_ref, w2_ref, b2_ref, w3_ref, b3_ref,
                        w34_ref, b34_ref, w5_ref, b5_ref, w6_ref, b6_ref,
                        xe_ref, xde_ref):
    # Cast to bf16 in-kernel (free VPU filler under MXU work).
    x = x_ref[...].astype(jnp.bfloat16)                       # (tm, IN_PAD)

    # ---- encoder ----
    h = jnp.dot(x, w1_ref[...], preferred_element_type=jnp.float32) + b1_ref[...]
    h = jnp.maximum(h, 0.0).astype(jnp.bfloat16)              # (tm, 512)
    h = jnp.dot(h, w2_ref[...], preferred_element_type=jnp.float32) + b2_ref[...]
    h = jnp.maximum(h, 0.0).astype(jnp.bfloat16)              # (tm, 256)

    # Feature output (lane-dense NF_PAD store), off the decoder critical path.
    xe = jnp.dot(h, w3_ref[...], preferred_element_type=jnp.float32) + b3_ref[...]
    xe_ref[...] = xe.astype(xe_ref.dtype)                     # (tm, NF_PAD) f32

    # ---- decoder (entry matmul fused: K = 256 instead of K = num_features) ----
    d = jnp.dot(h, w34_ref[...], preferred_element_type=jnp.float32) + b34_ref[...]
    d = jnp.maximum(d, 0.0).astype(jnp.bfloat16)              # (tm, 256)
    d = jnp.dot(d, w5_ref[...], preferred_element_type=jnp.float32) + b5_ref[...]
    d = jnp.maximum(d, 0.0).astype(jnp.bfloat16)              # (tm, 512)
    xd = jnp.dot(d, w6_ref[...], preferred_element_type=jnp.float32) + b6_ref[...]
    xde_ref[...] = xd.astype(xde_ref.dtype)                   # (tm, IN_PAD) f32


# ----------------------------------------------------------------------------
# Wrapper
# ----------------------------------------------------------------------------
_PARAM_NAMES = ("w1", "b1", "w2", "b2", "w3", "b3",
                "w34", "b34", "w5", "b5", "w6", "b6")


def _choose_tile(b_pad, tile_m):
    """Pick a batch tile: multiple of 8, <= b_pad, and (when possible) giving a
    grid of length >= 2 so v7x's two TensorCores both get work."""
    tm = _round_up(max(8, min(tile_m, b_pad)), 8)
    if b_pad >= 16 and pl.cdiv(b_pad, tm) < 2:
        tm = _round_up(pl.cdiv(b_pad, 2), 8)
    return tm


def autoencoder_forward(x, prepared_params, *, input_size, num_features,
                        tile_m=512):
    """Forward pass of the PyTorch AutoEncoder.

    x: any shape flattening to (-1, input_size)
    prepared_params: output of prepare_params() (lane-padded bf16 weights,
                     f32 biases, fused decoder-entry W34/b34)
    returns (x_e: (B, num_features) f32, x_de: (B, 1, input_size) f32)
    """
    in_pad = _round_up(input_size, 128)
    nf_pad = _round_up(num_features, 128)

    x2d = x.reshape(-1, input_size)                 # == x.view(-1, input_size)
    B = x2d.shape[0]
    B_pad = _round_up(B, 8)                         # only sublane-pad the batch
    if B_pad != B or in_pad != input_size:
        x2d = jnp.pad(x2d, ((0, B_pad - B), (0, in_pad - input_size)))
    x2d = x2d.astype(jnp.float32)                   # cast to bf16 happens in-kernel

    tm = _choose_tile(B_pad, tile_m)
    grid = (pl.cdiv(B_pad, tm),)

    weight_args = [prepared_params[n] for n in _PARAM_NAMES]

    in_specs = [pl.BlockSpec((tm, in_pad), lambda i: (i, 0))]
    # All weights/biases are 2-D and grid-invariant (stay resident in VMEM).
    # TODO(synk): on v7x, pipeline_mode=pl.Buffered(1) would halve their VMEM
    # footprint; skipped here for portability (footprint is ~1 MiB anyway).
    in_specs += [pl.BlockSpec(prepared_params[n].shape, lambda i: (0, 0))
                 for n in _PARAM_NAMES]

    out_specs = [
        pl.BlockSpec((tm, nf_pad), lambda i: (i, 0)),
        pl.BlockSpec((tm, in_pad), lambda i: (i, 0)),
    ]
    out_shape = (
        jax.ShapeDtypeStruct((B_pad, nf_pad), jnp.float32),
        jax.ShapeDtypeStruct((B_pad, in_pad), jnp.float32),
    )

    # Advisory cost estimate for the XLA scheduler.
    macs_per_row = (in_pad * HIDDEN1_PAD + HIDDEN1_PAD * HIDDEN2
                    + HIDDEN2 * nf_pad            # xe
                    + HIDDEN2 * HIDDEN2           # fused W34
                    + HIDDEN2 * HIDDEN1_PAD + HIDDEN1_PAD * in_pad)
    weight_bytes = sum(int(a.size) * a.dtype.itemsize for a in weight_args)
    cost = pl.CostEstimate(
        flops=2 * B_pad * macs_per_row,
        transcendentals=0,
        bytes_accessed=(B_pad * in_pad * 4                           # x (f32)
                        + B_pad * (nf_pad + in_pad) * 4              # outputs
                        + weight_bytes),
    )

    # VMEM budget from the actual footprint (default double-buffering) + slack.
    io_bytes = tm * (in_pad + nf_pad + in_pad) * 4
    vmem_limit = int(min(max(4 * (weight_bytes + io_bytes) + (4 << 20),
                             16 << 20), 32 << 20))

    xe, xde = pl.pallas_call(
        _autoencoder_kernel,
        out_shape=out_shape,
        grid_spec=pltpu.PrefetchScalarGridSpec(
            num_scalar_prefetch=0,
            grid=grid,
            in_specs=in_specs,
            out_specs=out_specs,
        ),
        compiler_params=pltpu.CompilerParams(
            dimension_semantics=("parallel",),
            vmem_limit_bytes=vmem_limit,
        ),
        cost_estimate=cost,
    )(x2d, *weight_args)

    x_e = xe[:B, :num_features]
    x_de = xde[:B, :input_size].reshape(-1, 1, input_size)   # == .view(-1,1,input_size)
    return x_e, x_de


# ----------------------------------------------------------------------------
# Parameter init (xavier_uniform weights, PyTorch-default uniform biases) and
# kernel-side preparation (lane padding + bf16 cast + decoder-entry fusion).
# ----------------------------------------------------------------------------
def init_params(key, input_size, num_features):
    layer_dims = [
        (input_size, HIDDEN1),      # encoder.0
        (HIDDEN1, HIDDEN2),         # encoder.2
        (HIDDEN2, num_features),    # encoder.4
        (num_features, HIDDEN2),    # decoder.0
        (HIDDEN2, HIDDEN1),         # decoder.2
        (HIDDEN1, input_size),      # decoder.4
    ]
    params = {}
    for idx, (fan_in, fan_out) in enumerate(layer_dims, start=1):
        key, kw, kb = jax.random.split(key, 3)
        bound_w = (6.0 / (fan_in + fan_out)) ** 0.5
        params[f"w{idx}"] = jax.random.uniform(
            kw, (fan_in, fan_out), jnp.float32, -bound_w, bound_w)
        bound_b = 1.0 / (fan_in ** 0.5)
        params[f"b{idx}"] = jax.random.uniform(
            kb, (1, fan_out), jnp.float32, -bound_b, bound_b)
    return params


def _pad_to(arr, shape):
    pads = [(0, t - s) for s, t in zip(arr.shape, shape)]
    return jnp.pad(arr, pads)


def prepare_params(params, *, input_size, num_features):
    """Lane-pad every dim to >=128, cast weights to bf16 (biases stay f32) and
    precompute the fused decoder entry W34 = w3 @ w4, b34 = b3 @ w4 + b4.

    Zero padding is exact: padded weight rows/cols and bias entries are zero
    and relu(0) = 0, so valid output columns are unchanged; padded output
    columns are sliced off in the wrapper.
    """
    in_pad = _round_up(input_size, 128)
    nf_pad = _round_up(num_features, 128)

    w34 = jnp.dot(params["w3"], params["w4"])                 # (256, 256) f32
    b34 = jnp.dot(params["b3"], params["w4"]) + params["b4"]  # (1, 256)   f32

    p = {}
    p["w1"] = _pad_to(params["w1"], (in_pad, HIDDEN1_PAD)).astype(jnp.bfloat16)
    p["b1"] = _pad_to(params["b1"], (1, HIDDEN1_PAD)).astype(jnp.float32)
    p["w2"] = _pad_to(params["w2"], (HIDDEN1_PAD, HIDDEN2)).astype(jnp.bfloat16)
    p["b2"] = params["b2"].astype(jnp.float32)
    p["w3"] = _pad_to(params["w3"], (HIDDEN2, nf_pad)).astype(jnp.bfloat16)
    p["b3"] = _pad_to(params["b3"], (1, nf_pad)).astype(jnp.float32)
    p["w34"] = w34.astype(jnp.bfloat16)
    p["b34"] = b34.astype(jnp.float32)
    p["w5"] = _pad_to(params["w5"], (HIDDEN2, HIDDEN1_PAD)).astype(jnp.bfloat16)
    p["b5"] = _pad_to(params["b5"], (1, HIDDEN1_PAD)).astype(jnp.float32)
    p["w6"] = _pad_to(params["w6"], (HIDDEN1_PAD, in_pad)).astype(jnp.bfloat16)
    p["b6"] = _pad_to(params["b6"], (1, in_pad)).astype(jnp.float32)
    return p


# ----------------------------------------------------------------------------
# Pure-JAX reference on the ORIGINAL (unpadded, unfused) params with the same
# bf16-input / f32-accumulate dtype policy as the kernel.
# ----------------------------------------------------------------------------
def reference_forward(x, params, *, input_size, num_features):
    def dense(a, w, b, relu):
        y = jnp.dot(a.astype(jnp.bfloat16), w.astype(jnp.bfloat16),
                    preferred_element_type=jnp.float32) + b.astype(jnp.float32)
        if relu:
            y = jnp.maximum(y, 0.0).astype(jnp.bfloat16)
        return y

    x2d = x.reshape(-1, input_size)
    h = dense(x2d, params["w1"], params["b1"], True)
    h = dense(h, params["w2"], params["b2"], True)
    xe = dense(h, params["w3"], params["b3"], False)
    d = dense(xe, params["w4"], params["b4"], True)
    d = dense(d, params["w5"], params["b5"], True)
    xd = dense(d, params["w6"], params["b6"], False)
    return xe, xd.reshape(-1, 1, input_size)


if __name__ == "__main__":
    INPUT_SIZE = 64
    NUM_FEATURES = 16
    BATCH = 48

    key = jax.random.PRNGKey(0)
    key, kx, kp = jax.random.split(key, 3)

    # Example input: (BATCH, 1, INPUT_SIZE); forward flattens to (BATCH, INPUT_SIZE).
    x = jax.random.normal(kx, (BATCH, 1, INPUT_SIZE), jnp.float32)
    params = init_params(kp, INPUT_SIZE, NUM_FEATURES)
    prepared = prepare_params(params, input_size=INPUT_SIZE,
                              num_features=NUM_FEATURES)

    fwd = functools.partial(autoencoder_forward,
                            input_size=INPUT_SIZE, num_features=NUM_FEATURES)

    # Config 1: default tile (split into >=2 grid steps -> both TCs on v7x).
    xe1, xde1 = fwd(x, prepared)
    # Config 2: small tile -> exercises the ragged-last-tile (cdiv) grid path.
    xe2, xde2 = fwd(x, prepared, tile_m=32)
    jax.block_until_ready((xe1, xde1, xe2, xde2))

    xe_ref, xde_ref = reference_forward(
        x, params, input_size=INPUT_SIZE, num_features=NUM_FEATURES)

    assert xe1.shape == (BATCH, NUM_FEATURES)
    assert xde1.shape == (BATCH, 1, INPUT_SIZE)
    assert xe2.shape == (BATCH, NUM_FEATURES)
    assert xde2.shape == (BATCH, 1, INPUT_SIZE)
    # xe follows the reference path exactly (modulo bf16 rounding).
    assert jnp.allclose(xe1, xe_ref, atol=2e-2, rtol=2e-2)
    # xde uses the fused (w3 @ w4) decoder entry -> slightly different rounding.
    assert jnp.allclose(xde1, xde_ref, atol=6e-2, rtol=6e-2)
    # Different tilings must agree with each other.
    assert jnp.allclose(xe1, xe2, atol=1e-3, rtol=1e-3)
    assert jnp.allclose(xde1, xde2, atol=1e-3, rtol=1e-3)

    print("KERNEL_OK")
</pallas_src>

<mosaic_0001>
module attributes {stable_mosaic.version = 11 : i64} {
  func.func @_autoencoder_kernel(%arg0: i32, %arg1: memref<24x128xf32, #tpu.memory_space<vmem>>, %arg2: memref<128x512xbf16, #tpu.memory_space<vmem>>, %arg3: memref<1x512xf32, #tpu.memory_space<vmem>>, %arg4: memref<512x256xbf16, #tpu.memory_space<vmem>>, %arg5: memref<1x256xf32, #tpu.memory_space<vmem>>, %arg6: memref<256x128xbf16, #tpu.memory_space<vmem>>, %arg7: memref<1x128xf32, #tpu.memory_space<vmem>>, %arg8: memref<256x256xbf16, #tpu.memory_space<vmem>>, %arg9: memref<1x256xf32, #tpu.memory_space<vmem>>, %arg10: memref<256x512xbf16, #tpu.memory_space<vmem>>, %arg11: memref<1x512xf32, #tpu.memory_space<vmem>>, %arg12: memref<512x128xbf16, #tpu.memory_space<vmem>>, %arg13: memref<1x128xf32, #tpu.memory_space<vmem>>, %arg14: memref<24x128xf32, #tpu.memory_space<vmem>>, %arg15: memref<24x128xf32, #tpu.memory_space<vmem>>) attributes {dimension_semantics = [#tpu.dimension_semantics<parallel>], iteration_bounds = array<i64: 2>, scalar_prefetch = 0 : i64, scratch_operands = 0 : i64, tpu.core_type = #tpu.core_type<tc>, window_params = [{transform_indices = @transform_0, window_bounds = array<i64: 24, 128>}, {pipeline_mode = #tpu.pipeline_mode<synchronous>, transform_indices = @transform_1, window_bounds = array<i64: 128, 512>}, {pipeline_mode = #tpu.pipeline_mode<synchronous>, transform_indices = @transform_2, window_bounds = array<i64: 1, 512>}, {pipeline_mode = #tpu.pipeline_mode<synchronous>, transform_indices = @transform_3, window_bounds = array<i64: 512, 256>}, {pipeline_mode = #tpu.pipeline_mode<synchronous>, transform_indices = @transform_4, window_bounds = array<i64: 1, 256>}, {pipeline_mode = #tpu.pipeline_mode<synchronous>, transform_indices = @transform_5, window_bounds = array<i64: 256, 128>}, {pipeline_mode = #tpu.pipeline_mode<synchronous>, transform_indices = @transform_6, window_bounds = array<i64: 1, 128>}, {pipeline_mode = #tpu.pipeline_mode<synchronous>, transform_indices = @transform_7, window_bounds = array<i64: 256, 256>}, {pipeline_mode = #tpu.pipeline_mode<synchronous>, transform_indices = @transform_8, window_bounds = array<i64: 1, 256>}, {pipeline_mode = #tpu.pipeline_mode<synchronous>, transform_indices = @transform_9, window_bounds = array<i64: 256, 512>}, {pipeline_mode = #tpu.pipeline_mode<synchronous>, transform_indices = @transform_10, window_bounds = array<i64: 1, 512>}, {pipeline_mode = #tpu.pipeline_mode<synchronous>, transform_indices = @transform_11, window_bounds = array<i64: 512, 128>}, {pipeline_mode = #tpu.pipeline_mode<synchronous>, transform_indices = @transform_12, window_bounds = array<i64: 1, 128>}, {transform_indices = @transform_13, window_bounds = array<i64: 24, 128>}, {transform_indices = @transform_14, window_bounds = array<i64: 24, 128>}]} {
    %c0 = arith.constant 0 : index
    %c0_0 = arith.constant 0 : index
    %0 = vector.load %arg1[%c0, %c0_0] : memref<24x128xf32, #tpu.memory_space<vmem>>, vector<24x128xf32>
    %1 = arith.truncf %0 : vector<24x128xf32> to vector<24x128xbf16>
    %c0_1 = arith.constant 0 : index
    %c0_2 = arith.constant 0 : index
    %2 = vector.load %arg2[%c0_1, %c0_2] : memref<128x512xbf16, #tpu.memory_space<vmem>>, vector<128x512xbf16>
    %cst = arith.constant dense<0.000000e+00> : vector<24x512xf32>
    %3 = tpu.matmul %1, %2, %cst {dimension_numbers = #tpu.dot_dimension_numbers<[1], [0], [0], [1], [0, 0, 1, 1], [], []>} : vector<24x128xbf16>, vector<128x512xbf16>, vector<24x512xf32> -> vector<24x512xf32>
    %c0_3 = arith.constant 0 : index
    %c0_4 = arith.constant 0 : index
    %4 = vector.load %arg3[%c0_3, %c0_4] : memref<1x512xf32, #tpu.memory_space<vmem>>, vector<1x512xf32>
    %5 = vector.broadcast %4 : vector<1x512xf32> to vector<24x512xf32>
    %6 = arith.addf %3, %5 : vector<24x512xf32>
    %cst_5 = arith.constant 0.000000e+00 : f32
    %7 = vector.broadcast %cst_5 : f32 to vector<24x512xf32>
    %8 = arith.maximumf %6, %7 : vector<24x512xf32>
    %9 = arith.truncf %8 : vector<24x512xf32> to vector<24x512xbf16>
    %c0_6 = arith.constant 0 : index
    %c0_7 = arith.constant 0 : index
    %10 = vector.load %arg4[%c0_6, %c0_7] : memref<512x256xbf16, #tpu.memory_space<vmem>>, vector<512x256xbf16>
    %cst_8 = arith.constant dense<0.000000e+00> : vector<24x256xf32>
    %11 = tpu.matmul %9, %10, %cst_8 {dimension_numbers = #tpu.dot_dimension_numbers<[1], [0], [0], [1], [0, 0, 1, 1], [], []>} : vector<24x512xbf16>, vector<512x256xbf16>, vector<24x256xf32> -> vector<24x256xf32>
    %c0_9 = arith.constant 0 : index
    %c0_10 = arith.constant 0 : index
    %12 = vector.load %arg5[%c0_9, %c0_10] : memref<1x256xf32, #tpu.memory_space<vmem>>, vector<1x256xf32>
    %13 = vector.broadcast %12 : vector<1x256xf32> to vector<24x256xf32>
    %14 = arith.addf %11, %13 : vector<24x256xf32>
    %cst_11 = arith.constant 0.000000e+00 : f32
    %15 = vector.broadcast %cst_11 : f32 to vector<24x256xf32>
    %16 = arith.maximumf %14, %15 : vector<24x256xf32>
    %17 = arith.truncf %16 : vector<24x256xf32> to vector<24x256xbf16>
    %c0_12 = arith.constant 0 : index
    %c0_13 = arith.constant 0 : index
    %18 = vector.load %arg6[%c0_12, %c0_13] : memref<256x128xbf16, #tpu.memory_space<vmem>>, vector<256x128xbf16>
    %cst_14 = arith.constant dense<0.000000e+00> : vector<24x128xf32>
    %19 = tpu.matmul %17, %18, %cst_14 {dimension_numbers = #tpu.dot_dimension_numbers<[1], [0], [0], [1], [0, 0, 1, 1], [], []>} : vector<24x256xbf16>, vector<256x128xbf16>, vector<24x128xf32> -> vector<24x128xf32>
    %c0_15 = arith.constant 0 : index
    %c0_16 = arith.constant 0 : index
    %20 = vector.load %arg7[%c0_15, %c0_16] : memref<1x128xf32, #tpu.memory_space<vmem>>, vector<1x128xf32>
    %21 = vector.broadcast %20 : vector<1x128xf32> to vector<24x128xf32>
    %22 = arith.addf %19, %21 : vector<24x128xf32>
    %c0_17 = arith.constant 0 : index
    %c0_18 = arith.constant 0 : index
    %23 = vector.load %arg14[%c0_17, %c0_18] : memref<24x128xf32, #tpu.memory_space<vmem>>, vector<24x128xf32>
    tpu.vector_store %arg14[%c0_17, %c0_18], %22 {strides = array<i32>} : memref<24x128xf32, #tpu.memory_space<vmem>>, vector<24x128xf32>,
    %c0_19 = arith.constant 0 : index
    %c0_20 = arith.constant 0 : index
    %24 = vector.load %arg8[%c0_19, %c0_20] : memref<256x256xbf16, #tpu.memory_space<vmem>>, vector<256x256xbf16>
    %cst_21 = arith.constant dense<0.000000e+00> : vector<24x256xf32>
    %25 = tpu.matmul %17, %24, %cst_21 {dimension_numbers = #tpu.dot_dimension_numbers<[1], [0], [0], [1], [0, 0, 1, 1], [], []>} : vector<24x256xbf16>, vector<256x256xbf16>, vector<24x256xf32> -> vector<24x256xf32>
    %c0_22 = arith.constant 0 : index
    %c0_23 = arith.constant 0 : index
    %26 = vector.load %arg9[%c0_22, %c0_23] : memref<1x256xf32, #tpu.memory_space<vmem>>, vector<1x256xf32>
    %27 = vector.broadcast %26 : vector<1x256xf32> to vector<24x256xf32>
    %28 = arith.addf %25, %27 : vector<24x256xf32>
    %cst_24 = arith.constant 0.000000e+00 : f32
    %29 = vector.broadcast %cst_24 : f32 to vector<24x256xf32>
    %30 = arith.maximumf %28, %29 : vector<24x256xf32>
    %31 = arith.truncf %30 : vector<24x256xf32> to vector<24x256xbf16>
    %c0_25 = arith.constant 0 : index
    %c0_26 = arith.constant 0 : index
    %32 = vector.load %arg10[%c0_25, %c0_26] : memref<256x512xbf16, #tpu.memory_space<vmem>>, vector<256x512xbf16>
    %cst_27 = arith.constant dense<0.000000e+00> : vector<24x512xf32>
    %33 = tpu.matmul %31, %32, %cst_27 {dimension_numbers = #tpu.dot_dimension_numbers<[1], [0], [0], [1], [0, 0, 1, 1], [], []>} : vector<24x256xbf16>, vector<256x512xbf16>, vector<24x512xf32> -> vector<24x512xf32>
    %c0_28 = arith.constant 0 : index
    %c0_29 = arith.constant 0 : index
    %34 = vector.load %arg11[%c0_28, %c0_29] : memref<1x512xf32, #tpu.memory_space<vmem>>, vector<1x512xf32>
    %35 = vector.broadcast %34 : vector<1x512xf32> to vector<24x512xf32>
    %36 = arith.addf %33, %35 : vector<24x512xf32>
    %cst_30 = arith.constant 0.000000e+00 : f32
    %37 = vector.broadcast %cst_30 : f32 to vector<24x512xf32>
    %38 = arith.maximumf %36, %37 : vector<24x512xf32>
    %39 = arith.truncf %38 : vector<24x512xf32> to vector<24x512xbf16>
    %c0_31 = arith.constant 0 : index
    %c0_32 = arith.constant 0 : index
    %40 = vector.load %arg12[%c0_31, %c0_32] : memref<512x128xbf16, #tpu.memory_space<vmem>>, vector<512x128xbf16>
    %cst_33 = arith.constant dense<0.000000e+00> : vector<24x128xf32>
    %41 = tpu.matmul %39, %40, %cst_33 {dimension_numbers = #tpu.dot_dimension_numbers<[1], [0], [0], [1], [0, 0, 1, 1], [], []>} : vector<24x512xbf16>, vector<512x128xbf16>, vector<24x128xf32> -> vector<24x128xf32>
    %c0_34 = arith.constant 0 : index
    %c0_35 = arith.constant 0 : index
    %42 = vector.load %arg13[%c0_34, %c0_35] : memref<1x128xf32, #tpu.memory_space<vmem>>, vector<1x128xf32>
    %43 = vector.broadcast %42 : vector<1x128xf32> to vector<24x128xf32>
    %44 = arith.addf %41, %43 : vector<24x128xf32>
    %c0_36 = arith.constant 0 : index
    %c0_37 = arith.constant 0 : index
    %45 = vector.load %arg15[%c0_36, %c0_37] : memref<24x128xf32, #tpu.memory_space<vmem>>, vector<24x128xf32>
    tpu.vector_store %arg15[%c0_36, %c0_37], %44 {strides = array<i32>} : memref<24x128xf32, #tpu.memory_space<vmem>>, vector<24x128xf32>,
    return
  }
  func.func @transform_0(%arg0: i32) -> (i32, i32) {
    %c0_i32 = arith.constant 0 : i32
    %c0_i32_0 = arith.constant 0 : i32
    return %arg0, %c0_i32 : i32, i32
  }
  func.func @transform_1(%arg0: i32) -> (i32, i32) {
    %c0_i32 = arith.constant 0 : i32
    %c0_i32_0 = arith.constant 0 : i32
    %c0_i32_1 = arith.constant 0 : i32
    return %c0_i32, %c0_i32_0 : i32, i32
  }
  func.func @transform_2(%arg0: i32) -> (i32, i32) {
    %c0_i32 = arith.constant 0 : i32
    %c0_i32_0 = arith.constant 0 : i32
    %c0_i32_1 = arith.constant 0 : i32
    return %c0_i32, %c0_i32_0 : i32, i32
  }
  func.func @transform_3(%arg0: i32) -> (i32, i32) {
    %c0_i32 = arith.constant 0 : i32
    %c0_i32_0 = arith.constant 0 : i32
    %c0_i32_1 = arith.constant 0 : i32
    return %c0_i32, %c0_i32_0 : i32, i32
  }
  func.func @transform_4(%arg0: i32) -> (i32, i32) {
    %c0_i32 = arith.constant 0 : i32
    %c0_i32_0 = arith.constant 0 : i32
    %c0_i32_1 = arith.constant 0 : i32
    return %c0_i32, %c0_i32_0 : i32, i32
  }
  func.func @transform_5(%arg0: i32) -> (i32, i32) {
    %c0_i32 = arith.constant 0 : i32
    %c0_i32_0 = arith.constant 0 : i32
    %c0_i32_1 = arith.constant 0 : i32
    return %c0_i32, %c0_i32_0 : i32, i32
  }
  func.func @transform_6(%arg0: i32) -> (i32, i32) {
    %c0_i32 = arith.constant 0 : i32
    %c0_i32_0 = arith.constant 0 : i32
    %c0_i32_1 = arith.constant 0 : i32
    return %c0_i32, %c0_i32_0 : i32, i32
  }
  func.func @transform_7(%arg0: i32) -> (i32, i32) {
    %c0_i32 = arith.constant 0 : i32
    %c0_i32_0 = arith.constant 0 : i32
    %c0_i32_1 = arith.constant 0 : i32
    return %c0_i32, %c0_i32_0 : i32, i32
  }
  func.func @transform_8(%arg0: i32) -> (i32, i32) {
    %c0_i32 = arith.constant 0 : i32
    %c0_i32_0 = arith.constant 0 : i32
    %c0_i32_1 = arith.constant 0 : i32
    return %c0_i32, %c0_i32_0 : i32, i32
  }
  func.func @transform_9(%arg0: i32) -> (i32, i32) {
    %c0_i32 = arith.constant 0 : i32
    %c0_i32_0 = arith.constant 0 : i32
    %c0_i32_1 = arith.constant 0 : i32
    return %c0_i32, %c0_i32_0 : i32, i32
  }
  func.func @transform_10(%arg0: i32) -> (i32, i32) {
    %c0_i32 = arith.constant 0 : i32
    %c0_i32_0 = arith.constant 0 : i32
    %c0_i32_1 = arith.constant 0 : i32
    return %c0_i32, %c0_i32_0 : i32, i32
  }
  func.func @transform_11(%arg0: i32) -> (i32, i32) {
    %c0_i32 = arith.constant 0 : i32
    %c0_i32_0 = arith.constant 0 : i32
    %c0_i32_1 = arith.constant 0 : i32
    return %c0_i32, %c0_i32_0 : i32, i32
  }
  func.func @transform_12(%arg0: i32) -> (i32, i32) {
    %c0_i32 = arith.constant 0 : i32
    %c0_i32_0 = arith.constant 0 : i32
    %c0_i32_1 = arith.constant 0 : i32
    return %c0_i32, %c0_i32_0 : i32, i32
  }
  func.func @transform_13(%arg0: i32) -> (i32, i32) {
    %c0_i32 = arith.constant 0 : i32
    %c0_i32_0 = arith.constant 0 : i32
    return %arg0, %c0_i32 : i32, i32
  }
  func.func @transform_14(%arg0: i32) -> (i32, i32) {
    %c0_i32 = arith.constant 0 : i32
    %c0_i32_0 = arith.constant 0 : i32
    return %arg0, %c0_i32 : i32, i32
  }
}

</mosaic_0001>

<bundles_post_ra>
// kernel: tpu_custom_call.1
= control target key start
LH: loop header
LB: loop body
LE: loop exit
PB: predicated region body
PF: predicated region fallthrough
CT: control target
= control target key end

     0   :  { %s5240_s0 = inlined_call_operand.hbm [shape: f32[48,128], index: 0, kind: input, shape index: {}]   ;;  %s5241_s1 = inlined_call_operand.hbm [shape: bf16[128,512], index: 1, kind: input, shape index: {}]   ;;  %s5242_s2 = inlined_call_operand.hbm [shape: f32[1,512], index: 2, kind: input, shape index: {}]   ;;  %s5243_s3 = inlined_call_operand.hbm [shape: bf16[512,256], index: 3, kind: input, shape index: {}]   ;;  %s5244_s4 = inlined_call_operand.vmem [shape: f32[1,256], index: 4, kind: input, shape index: {}]   ;;  %s5245_s5 = inlined_call_operand.hbm [shape: bf16[256,128], index: 5, kind: input, shape index: {}]   ;;  %s5246_s6 = inlined_call_operand.vmem [shape: f32[1,128], index: 6, kind: input, shape index: {}]   ;;  %s5247_s7 = inlined_call_operand.hbm [shape: bf16[256,256], index: 7, kind: input, shape index: {}]   ;;  %s5248_s8 = inlined_call_operand.hbm [shape: f32[1,256], index: 8, kind: input, shape index: {}]   ;;  %s5249_s9 = inlined_call_operand.hbm [shape: bf16[256,512], index: 9, kind: input, shape index: {}]   ;;  %s5250_s10 = inlined_call_operand.vmem [shape: f32[1,512], index: 10, kind: input, shape index: {}]   ;;  %s5251_s11 = inlined_call_operand.hbm [shape: bf16[512,128], index: 11, kind: input, shape index: {}]   ;;  %s5252_s12 = inlined_call_operand.vmem [shape: f32[1,128], index: 12, kind: input, shape index: {}]   ;;  %s5253_s13 = inlined_call_operand.hbm [shape: f32[48,128], index: 13, kind: output, shape index: {0}]   ;;  %s5254_s14 = inlined_call_operand.hbm [shape: f32[48,128], index: 14, kind: output, shape index: {1}]  }
   0x1   :  { %5259 = sst [smem:[#allocation27_spill]] %s5241_s1 }
   0x2   :  { %5260 = sst [smem:[#allocation28_spill]] %s5242_s2 }
   0x3   :  { %5261 = sst [smem:[#allocation29_spill]] %s5243_s3 }
   0x4   :  { %5262 = sst [smem:[#allocation30_spill]] %s5245_s5 }
   0x5   :  { %5263 = sst [smem:[#allocation31_spill]] %s5247_s7 }
   0x6   :  { %5264 = sst [smem:[#allocation32_spill]] %s5249_s9 }
   0x7   :  { %5265 = sst [smem:[#allocation33_spill]] %s5250_s10 }
   0x8   :  { %5266 = sst [smem:[#allocation34_spill]] %s5252_s12 }
   0x9   :  { %5267 = sst [smem:[#allocation35_spill]] %s5253_s13 }
   0xa   :  { %5268 = sst [smem:[#allocation36_spill]] %s5254_s14 }
   0xb   :  { %20 = vsyncpa [#allocation3], 0 }
   0xc   :  { %22 = vsyncpa [#allocation3 + $0x1], 0 }
   0xd   :  { %23 = vsyncpa [#allocation6], 0 }
   0xe   :  { %24 = vsyncpa [#allocation9], 0 }
   0xf   :  { %25 = vsyncpa [#allocation12], 0 }
  0x10   :  { %26 = vsyncpa [#allocation15], 0 }
  0x11   :  { %27 = vsyncpa [#allocation4], 0 }
  0x12   :  { %29 = vsyncpa [#allocation4 + $0x1], 0 }
  0x13   :  { %30 = vsyncpa [#allocation19], 0 }
  0x14   :  { %32 = vsyncpa [#allocation19 + $0x1], 0  ;;  %s4902_s29 = smov 0   ;;  %s4904_s30 = smov 0  }
  0x15   :  { %s4906_s15 = smov 0   ;;  %s4908_s16 = smov 0  }
  0x16 LB: > { %s5269_s1 = sld [smem:[#allocation27_spill]]  ;;  %s4926_s20 = sadd.s32 4294967295, %s4809_s16   ;;  %s4809_s16 = sphi %s4908_s16, %s5291_s16   ;;  %s4805_s15 = sphi %s4906_s15, %s5290_s15   ;;  %s4801_s30 = sphi %s4904_s30, %s5289_s30   ;;  %s4797_s29 = sphi %s4902_s29, %s5288_s29  }
  0x17   : > { %p3038_p0 = scmp.ge.s32.totalorder %s4809_s16, 1  ;;  %p59_p1 = scmp.eq.s32.totalorder %s4926_s20, 0 }
  0x18   : > { %p373_p2 = scmp.lt.s32.totalorder %s4809_s16, 3  ;;  %s4811_s22 = smov [#allocation5]  }
  0x19   : > { %s386_s23 = sshll.u32 %s4811_s22, 4  ;;  %s5271_s3 = sld [smem:[#allocation29_spill]]  ;;  %s387_s23 = int_to_ptr.vmem [resolvable:$true] %s386_s23 }
  0x1a   : > { %p4931_p3 = pnand %p3038_p0, %p373_p2  ;;  %s4812_s28 = smov [#allocation8]  }
  0x1b   : > { %s412_s17 = sshll.u32 %s4812_s28, 4  ;;  %s4813_s18 = smov 256   ;;  %s413_s17 = int_to_ptr.vmem [resolvable:$true] %s412_s17 }
  0x1c   : > { %s384_s19 = sshll.u32 %s5269_s1, 4  ;;  %p4321_p4 = pneg %p4931_p3  ;;  %s385_s19 = int_to_ptr.hbm [resolvable:$true] %s384_s19 }
  0x1d   : > { %s4814_s22 = smov 16   ;;  %s5257_s1 = smov 128  }
  0x1e   : > { %p4943_p6 = pnand %p4321_p4, %p59_p1  ;;  %s5258_s24 = smov 8  }
  0x1f   : > { %s410_s26 = sshll.u32 %s5271_s3, 4  ;;  %s5273_s7 = sld [smem:[#allocation31_spill]]  ;;  %s411_s26 = int_to_ptr.hbm [resolvable:$true] %s410_s26 }
  0x20   : > { %4324 = dma.hbm_to_vmem [thread:$0]  (!%p4943_p6), %s385_s19, 4096, %s387_s23, [#allocation6], %s4813_s18, %s4813_s18, %s4814_s22  }
  0x21   : > { %4330 = dma.hbm_to_vmem [thread:$0]  (!%p4943_p6), %s411_s26, 8192, %s413_s17, [#allocation9], %s5257_s1, %s5257_s1, %s5258_s24  }
  0x22   : > { %s4817_s12 = smov [#allocation11]   ;;  %s5274_s9 = sld [smem:[#allocation32_spill]] }
  0x23   : > { %s446_s28 = sshll.u32 %s4817_s12, 4  ;;  %s4818_s26 = smov [#allocation14]   ;;  %s447_s28 = int_to_ptr.vmem [resolvable:$true] %s446_s28 }
  0x24   : > { %s472_s17 = sshll.u32 %s4818_s26, 4  ;;  %s5275_s2 = sld [smem:[#allocation28_spill]]  ;;  %s473_s17 = int_to_ptr.vmem [resolvable:$true] %s472_s17 }
  0x25   : > { %s444_s14 = sshll.u32 %s5273_s7, 4  ;;  %s5276_s5 = sld [smem:[#allocation30_spill]]  ;;  %s445_s14 = int_to_ptr.hbm [resolvable:$true] %s444_s14 }
  0x26   : > { %4336 = dma.hbm_to_vmem [thread:$0]  (!%p4943_p6), %s445_s14, 4096, %s447_s28, [#allocation12], %s5257_s1, %s5257_s1, %s5258_s24  }
  0x27   : > { %s4819_s7 = smov [#allocation7]   ;;  %s4820_s14 = smov [#allocation10]  }
  0x28   : > { %s470_s23 = sshll.u32 %s5274_s9, 4  ;;  %s401_s9 = sshll.u32 %s4819_s7, 4  ;;  %s471_s23 = int_to_ptr.hbm [resolvable:$true] %s470_s23  ;;  %s402_s9 = int_to_ptr.vmem [resolvable:$true] %s401_s9 }
  0x29   : > { %4342 = dma.hbm_to_vmem [thread:$0]  (!%p4943_p6), %s471_s23, 8192, %s473_s17, [#allocation15], %s4813_s18, %s4813_s18, %s4814_s22  }
  0x2a   : > { %s399_s25 = sshll.u32 %s5275_s2, 4  ;;  %s429_s28 = sshll.u32 %s4820_s14, 4  ;;  %s400_s25 = int_to_ptr.hbm [resolvable:$true] %s399_s25  ;;  %s430_s28 = int_to_ptr.vmem [resolvable:$true] %s429_s28 }
  0x2b   : > { %s427_s19 = sshll.u32 %s5276_s5, 4  ;;  %s4821_s10 = smov 64   ;;  %s428_s19 = int_to_ptr.hbm [resolvable:$true] %s427_s19 }
  0x2c   : > { %4327 = dma.hbm_to_vmem [thread:$0]  (!%p4943_p6), %s400_s25, 64, %s402_s9, [#allocation6]  }
  0x2d   : > { %s4822_s26 = smov 4   ;;  %s459_s7 = sshll.u32 %s5248_s8, 4  ;;  %s460_s7 = int_to_ptr.hbm [resolvable:$true] %s459_s7 }
  0x2e   : > { %4333 = dma.hbm_to_vmem [thread:$0]  (!%p4943_p6), %s428_s19, 2048, %s430_s28, [#allocation9], %s4821_s10, %s4821_s10, %s4822_s26  }
  0x2f   : > { %s4823_s9 = smov [#allocation13]   ;;  %s487_s25 = sshll.u32 %s5251_s11, 4  ;;  %s488_s25 = int_to_ptr.hbm [resolvable:$true] %s487_s25 }
  0x30   : > { %s461_s23 = sshll.u32 %s4823_s9, 4  ;;  %s4824_s12 = smov [#allocation16]   ;;  %s462_s23 = int_to_ptr.vmem [resolvable:$true] %s461_s23 }
  0x31   : > { %4339 = dma.hbm_to_vmem [thread:$0]  (!%p4943_p6), %s460_s7, 32, %s462_s23, [#allocation12]  }
  0x32   : > { %s489_s13 = sshll.u32 %s4824_s12, 4  ;;  %s3037_s19 = sadd.s32 4294967294, %s4809_s16   ;;  %s490_s13 = int_to_ptr.vmem [resolvable:$true] %s489_s13 }
  0x33   : > { %4345 = dma.hbm_to_vmem [thread:$0]  (!%p4943_p6), %s488_s25, 4096, %s490_s13, [#allocation15], %s4821_s10, %s4821_s10, %s4822_s26  }
  0x34   : > { %s4989_s14 = sadd.s32 1, %s4809_s16   ;;  %s45_s18 = sadd.s32 1, %s4805_s15 }
  0x35   : > { %s42_s28 = ssub.s32 %s4809_s16, %s4989_s14  ;;  %p52_p8 = scmp.ne.s32.totalorder %s4805_s15, %s4801_s30 }
  0x36   : > { %p43_p7 = scmp.eq.s32.totalorder %s42_s28, 0  ;;  %p53_p9 = scmp.eq.s32.totalorder %s4809_s16, 0 }
  0x37   : > { %p58_p10 = scmp.ne.s32.totalorder %s4801_s30, %s4797_s29  ;;  %p334_p13 = scmp.eq.s32.totalorder %s4926_s20, 1 }
  0x38   : > { %s5000_s22 = scalar_select %p43_p7, %s4805_s15, %s45_s18  }
  0x39   : > { %p54_p11 = por %p53_p9, %p52_p8  ;;  %p5004_p12 = por %p59_p1, %p58_p10 }
  0x3a   : > { %p340_p0 = scmp.eq.s32.totalorder %s3037_s19, 1  ;;  %p4365_p2 = scmp.lt.s32.totalorder %s4809_s16, 2 }
  0x3b   : > { %s506_s27 = sand.u32 1, %s4805_s15   ;;  %p5011_p4 = por %p334_p13, %p52_p8 }
  0x3c   : > { %p5015_p6 = por %p340_p0, %p58_p10  ;;  %s4281_s9 = smul.u32 24, %s506_s27 }
  0x3d   : > { %s4022_s23 = smul.u32 24, %s4809_s16  ;;  %p5020_p7 = pnand %p4365_p2, %p54_p11 }
  0x3e   : > { %s510_s13 = scalar_lea.vmem [#allocation2], %s4281_s9  ;;  %s507_s18 = scalar_lea.sflag [#allocation3], %s506_s27 }
  0x3f   : > { %s515_s12 = scalar_lea.hbm %s5240_s0, %s4022_s23  ;;  %s518_s19 = sshll.u32 %s510_s13, 4  ;;  %s519_s19 = int_to_ptr.vmem [resolvable:$true] %s518_s19 }
  0x40   : > { %s516_s28 = sshll.u32 %s515_s12, 4  ;;  %p4669_p9 = pneg %p5020_p7  ;;  %s517_s28 = int_to_ptr.hbm [resolvable:$true] %s516_s28 }
  0x41   : > { %s4665_s1 = sshra.s32 %s517_s28, 4  ;;  %s4672_s3 = scalar_lea.hbm %s5240_s0, 48  ;;  %s4666_s1 = int_to_ptr.hbm [resolvable:$true] %s4665_s1 }
  0x42   : > { %s4667_s24 = scalar_lea.hbm %s4666_s1, 24  ;;  %p4673_p13 = scmp.lt.s32.totalorder %s4666_s1, %s5240_s0 }
  0x43   : > { %p4668_p8 = scmp.ne.s32.totalorder %s4666_s1, %s4667_s24  ;;  %p4674_p0 = scmp.lt.s32.totalorder %s4672_s3, %s4667_s24 }
  0x45   : > { %p4670_p10 = pnand %p4669_p9, %p4668_p8  ;;  %p4675_p2 = por %p4674_p0, %p4673_p13 }
  0x47   : > { %p4671_p11 = pneg %p4670_p10 }
  0x49   : > { %p4676_p5 = pnand %p4675_p2, %p4671_p11 }
  0x4b   : > { %4679 = shalt.err (!%p4676_p5)
}
  0x4c   : > { %s5281_s27 = smov 8   ;;  %s5282_s9 = smov 128  }
  0x4d   : > { %4349 = dma.hbm_to_vmem [thread:$0]  (!%p5020_p7), %s517_s28, 384, %s519_s19, %s507_s18, %s5282_s9, %s5282_s9, %s5281_s27  }
  0x4e   : > { %530 = sbr.rel (%p4931_p3) target bundleno = 952 (0x3b8), region = 72  ;;  %s5043_s2 = sand.u32 (!%p4931_p3), 1, %s4801_s30  }
  0x4f   : > { %s5046_s1 = smul.u32 (!%p4931_p3), 24, %s5043_s2  ;;  %s533_s5 = scalar_lea.sflag (!%p4931_p3), [#allocation3], %s5043_s2 }
  0x51   : > { %s5050_s24 = scalar_lea.vmem (!%p4931_p3), [#allocation2], %s5046_s1 }
  0x53   : > { %4768 = dma.done.wait (%p5004_p12), %s533_s5, 384  }
  0x54   : > { %4770 = vsyncadd (%p5004_p12), %s533_s5, 4294966912 }
  0x55   : > { %4772 = dma.done.wait (%p59_p1), [#allocation6], 4160  }
  0x56   : > { %4774 = vsyncadd (%p59_p1), [#allocation6], 4294963136 }
  0x57   : > { %4776 = dma.done.wait (%p59_p1), [#allocation9], 10240  }
  0x58   : > { %4778 = vsyncadd (%p59_p1), [#allocation9], 4294957056 }
  0x59   : > { %4780 = dma.done.wait (%p59_p1), [#allocation12], 4128  }
  0x5a   : > { %4782 = vsyncadd (%p59_p1), [#allocation12], 4294963168 }
  0x5b   : > { %4784 = dma.done.wait (%p59_p1), [#allocation15], 12288  }
  0x5c   : > { %4786 = vsyncadd (%p59_p1), [#allocation15], 4294955008  ;;  %v3172_v0 = vld [vmem:[#allocation5 + $0xe0] sm:$0xf]  ;;  %v4053_v1 = vld [vmem:[#allocation5 + $0xec] sm:$0xf0] }
  0x5d   : > { %v4051_v2 = vld [vmem:[#allocation5 + $0xe4] sm:$0xf]  ;;  %v3173_v3 = vor.u32 %v4053_v1, %v3172_v0  ;;  %v3174_v4 = vld [vmem:[#allocation5 + $0xf0] sm:$0xf0]  ;;  %v3180_v5 = vld [vmem:[#allocation5 + $0xe8] sm:$0xf] }
  0x5e   : > { %v4054_v6 = vld [vmem:[#allocation5 + $0xf4] sm:$0xf0]  ;;  %v3177_v7 = vor.u32 %v4051_v2, %v3174_v4  ;;  %v4052_v9 = vld [vmem:[#allocation5 + $0xec] sm:$0xf]  ;;  %v3182_v10 = vld [vmem:[#allocation5 + $0xf8] sm:$0xf0] }
  0x5f   : > { %v3181_v8 = vor.u32 %v4054_v6, %v3180_v5  ;;  %v3156_v11 = vld [vmem:[#allocation5 + $0xc0] sm:$0xf]  ;;  %837 = vmatpush.bf16.msra.mxu0 %v3173_v3  ;;  %v3185_v12 = vor.u32 %v4052_v9, %v3182_v10  ;;  %v4049_v13 = vld [vmem:[#allocation5 + $0xcc] sm:$0xf0]  ;;  %v4047_v14 = vld [vmem:[#allocation5 + $0xc4] sm:$0xf] }
  0x60   : > { %v3158_v15 = vld [vmem:[#allocation5 + $0xd0] sm:$0xf0]  ;;  %855 = vmatpush.bf16.msra.mxu1 %v3177_v7  ;;  %v3157_v16 = vor.u32 %v4049_v13, %v3156_v11  ;;  %v3164_v18 = vld [vmem:[#allocation5 + $0xc8] sm:$0xf]  ;;  %v4050_v19 = vld [vmem:[#allocation5 + $0xd4] sm:$0xf0] }
  0x61   : > { %873 = vmatpush.bf16.msra.mxu2 %v3181_v8  ;;  %v3161_v17 = vor.u32 %v4047_v14, %v3158_v15  ;;  %v4048_v20 = vld [vmem:[#allocation5 + $0xcc] sm:$0xf]  ;;  %891 = vmatpush.bf16.msra.mxu3 %v3185_v12  ;;  %v3165_v21 = vor.u32 %v4050_v19, %v3164_v18  ;;  %v3166_v22 = vld [vmem:[#allocation5 + $0xd8] sm:$0xf0]  ;;  %v3140_v23 = vld [vmem:[#allocation5 + $0xa0] sm:$0xf] }
  0x62   : > { %v4045_v24 = vld [vmem:[#allocation5 + $0xac] sm:$0xf0]  ;;  %v3169_v25 = vor.u32 %v4048_v20, %v3166_v22  ;;  %v4043_v26 = vld [vmem:[#allocation5 + $0xa4] sm:$0xf]  ;;  %v3142_v27 = vld [vmem:[#allocation5 + $0xb0] sm:$0xf0] }
  0x63   : > { %v3148_v28 = vld [vmem:[#allocation5 + $0xa8] sm:$0xf]  ;;  %838 = vmatpush.bf16.msra.mxu0 %v3157_v16  ;;  %v3141_v29 = vor.u32 %v4045_v24, %v3140_v23  ;;  %v4046_v30 = vld [vmem:[#allocation5 + $0xb4] sm:$0xf0]  ;;  %v4044_v31 = vld [vmem:[#allocation5 + $0xac] sm:$0xf]  ;;  %v3145_v33 = vor.u32 %v4043_v26, %v3142_v27 }
  0x64   : > { %v3150_v32 = vld [vmem:[#allocation5 + $0xb8] sm:$0xf0]  ;;  %856 = vmatpush.bf16.msra.mxu1 %v3161_v17  ;;  %v3149_v34 = vor.u32 %v4046_v30, %v3148_v28  ;;  %v3124_v35 = vld [vmem:[#allocation5 + $0x80] sm:$0xf]  ;;  %v4041_v36 = vld [vmem:[#allocation5 + $0x8c] sm:$0xf0] }
  0x65   : > { %874 = vmatpush.bf16.msra.mxu2 %v3165_v21  ;;  %v4039_v37 = vld [vmem:[#allocation5 + $0x84] sm:$0xf]  ;;  %892 = vmatpush.bf16.msra.mxu3 %v3169_v25  ;;  %v3153_v38 = vor.u32 %v4044_v31, %v3150_v32  ;;  %v3126_v39 = vld [vmem:[#allocation5 + $0x90] sm:$0xf0]  ;;  %v3132_v40 = vld [vmem:[#allocation5 + $0x88] sm:$0xf]  ;;  %v3125_v44 = vor.u32 %v4041_v36, %v3124_v35 }
  0x66   : > { %v4042_v41 = vld [vmem:[#allocation5 + $0x94] sm:$0xf0]  ;;  %v4040_v42 = vld [vmem:[#allocation5 + $0x8c] sm:$0xf]  ;;  %v3134_v43 = vld [vmem:[#allocation5 + $0x98] sm:$0xf0]  ;;  %v3129_v45 = vor.u32 %v4039_v37, %v3126_v39 }
  0x67   : > { %839 = vmatpush.bf16.msra.mxu0 %v3141_v29  ;;  %v3133_v46 = vor.u32 %v4042_v41, %v3132_v40  ;;  %v3108_v47 = vld [vmem:[#allocation5 + $0x60] sm:$0xf]  ;;  %v4037_v48 = vld [vmem:[#allocation5 + $0x6c] sm:$0xf0]  ;;  %v4035_v49 = vld [vmem:[#allocation5 + $0x64] sm:$0xf]  ;;  %v3137_v50 = vor.u32 %v4040_v42, %v3134_v43 }
  0x68   : > { %857 = vmatpush.bf16.msra.mxu1 %v3145_v33  ;;  %v3110_v51 = vld [vmem:[#allocation5 + $0x70] sm:$0xf0]  ;;  %v3116_v52 = vld [vmem:[#allocation5 + $0x68] sm:$0xf]  ;;  %v4038_v53 = vld [vmem:[#allocation5 + $0x74] sm:$0xf0]  ;;  %v3109_v56 = vor.u32 %v4037_v48, %v3108_v47 }
  0x69   : > { %875 = vmatpush.bf16.msra.mxu2 %v3149_v34  ;;  %893 = vmatpush.bf16.msra.mxu3 %v3153_v38  ;;  %v4036_v54 = vld [vmem:[#allocation5 + $0x6c] sm:$0xf]  ;;  %v3118_v55 = vld [vmem:[#allocation5 + $0x78] sm:$0xf0]  ;;  %v3113_v57 = vor.u32 %v4035_v49, %v3110_v51  ;;  %v3117_v58 = vor.u32 %v4038_v53, %v3116_v52  ;;  %v3092_v59 = vld [vmem:[#allocation5 + $0x40] sm:$0xf] }
  0x6a   : > { %v4033_v60 = vld [vmem:[#allocation5 + $0x4c] sm:$0xf0]  ;;  %v4031_v61 = vld [vmem:[#allocation5 + $0x44] sm:$0xf]  ;;  %v3121_v62 = vor.u32 %v4036_v54, %v3118_v55  ;;  %v3094_v63 = vld [vmem:[#allocation5 + $0x50] sm:$0xf0] }
  0x6b   : > { %840 = vmatpush.bf16.msra.mxu0 %v3125_v44  ;;  %v3100_v0 = vld [vmem:[#allocation5 + $0x48] sm:$0xf]  ;;  %v4034_v1 = vld [vmem:[#allocation5 + $0x54] sm:$0xf0]  ;;  %v4032_v2 = vld [vmem:[#allocation5 + $0x4c] sm:$0xf]  ;;  %v3093_v4 = vor.u32 %v4033_v60, %v3092_v59  ;;  %v3097_v5 = vor.u32 %v4031_v61, %v3094_v63 }
  0x6c   : > { %858 = vmatpush.bf16.msra.mxu1 %v3129_v45  ;;  %v3102_v3 = vld [vmem:[#allocation5 + $0x58] sm:$0xf0]  ;;  %v3101_v6 = vor.u32 %v4034_v1, %v3100_v0  ;;  %v3076_v7 = vld [vmem:[#allocation5 + $0x20] sm:$0xf]  ;;  %v4029_v8 = vld [vmem:[#allocation5 + $0x2c] sm:$0xf0] }
  0x6d   : > { %876 = vmatpush.bf16.msra.mxu2 %v3133_v46  ;;  %894 = vmatpush.bf16.msra.mxu3 %v3137_v50  ;;  %v4027_v9 = vld [vmem:[#allocation5 + $0x24] sm:$0xf]  ;;  %v3105_v10 = vor.u32 %v4032_v2, %v3102_v3  ;;  %v3078_v11 = vld [vmem:[#allocation5 + $0x30] sm:$0xf0]  ;;  %v3084_v12 = vld [vmem:[#allocation5 + $0x28] sm:$0xf]  ;;  %v3077_v16 = vor.u32 %v4029_v8, %v3076_v7 }
  0x6e   : > { %v4030_v13 = vld [vmem:[#allocation5 + $0x34] sm:$0xf0]  ;;  %v4028_v14 = vld [vmem:[#allocation5 + $0x2c] sm:$0xf]  ;;  %v3086_v15 = vld [vmem:[#allocation5 + $0x38] sm:$0xf0]  ;;  %v3081_v19 = vor.u32 %v4027_v9, %v3078_v11 }
  0x6f   : > { %841 = vmatpush.bf16.msra.mxu0 %v3109_v56  ;;  %v3060_v17 = vld [vmem:[#allocation5] sm:$0xf]  ;;  %v4025_v18 = vld [vmem:[#allocation5 + $0xc] sm:$0xf0]  ;;  %v3085_v20 = vor.u32 %v4030_v13, %v3084_v12  ;;  %v4023_v21 = vld [vmem:[#allocation5 + $0x4] sm:$0xf]  ;;  %v3089_v24 = vor.u32 %v4028_v14, %v3086_v15 }
  0x70   : > { %859 = vmatpush.bf16.msra.mxu1 %v3113_v57  ;;  %v3062_v22 = vld [vmem:[#allocation5 + $0x10] sm:$0xf0]  ;;  %v3068_v23 = vld [vmem:[#allocation5 + $0x8] sm:$0xf]  ;;  %v4026_v25 = vld [vmem:[#allocation5 + $0x14] sm:$0xf0]  ;;  %v3061_v31 = vor.u32 %v4025_v18, %v3060_v17 }
  0x71   : > { %877 = vmatpush.bf16.msra.mxu2 %v3117_v58  ;;  %895 = vmatpush.bf16.msra.mxu3 %v3121_v62  ;;  %v4024_v26 = vld [vmem:[#allocation5 + $0xc] sm:$0xf]  ;;  %v3070_v27 = vld [vmem:[#allocation5 + $0x18] sm:$0xf0]  ;;  %v3244_v29 = vld [vmem:[#allocation8 + $0x70] sm:$0xf]  ;;  %v3065_v35 = vor.u32 %v4023_v21, %v3062_v22  ;;  %v3069_v36 = vor.u32 %v4026_v25, %v3068_v23 }
  0x72   : > { %v630_v28 = vld [vmem:[%s5050_s24] sm:$0xff]  ;;  %v4070_v30 = vld [vmem:[#allocation8 + $0x74] sm:$0xf0]  ;;  %v3073_v37 = vor.u32 %v4024_v26, %v3070_v27  ;;  %v3236_v39 = vld [vmem:[#allocation8 + $0x60] sm:$0xf]  ;;  %s5131_s13 = scalar_lea.vmem [#allocation17], %s5046_s1 }
  0x73   : > { %842 = vmatpush.bf16.msra.mxu0 %v3093_v4  ;;  %v631_v32 = vld [vmem:[%s5050_s24 + $0x8] sm:$0xff]  ;;  %v3245_v38 = vor.u32 %v4070_v30, %v3244_v29  ;;  %v4068_v44 = vld [vmem:[#allocation8 + $0x64] sm:$0xf0]  ;;  %v3300_v47 = vld [vmem:[#allocation8 + $0xe0] sm:$0xf]  ;;  %s5283_s18 = sld [smem:[#allocation33_spill]] }
  0x74   : > { %860 = vmatpush.bf16.msra.mxu1 %v3097_v5  ;;  %v3308_v33 = vld [vmem:[#allocation8 + $0xf0] sm:$0xf]  ;;  %v4086_v34 = vld [vmem:[#allocation8 + $0xf4] sm:$0xf0]  ;;  %v633_v42 = vpack.c.bf16 %v631_v32, %v630_v28  ;;  %v4084_v48 = vld [vmem:[#allocation8 + $0xe4] sm:$0xf0]  ;;  %v3237_v50 = vor.u32 %v4068_v44, %v3236_v39 }
  0x75   : > { %878 = vmatpush.bf16.msra.mxu2 %v3101_v6  ;;  %896 = vmatpush.bf16.msra.mxu3 %v3105_v10  ;;  %v3372_v40 = vld [vmem:[#allocation8 + $0x170] sm:$0xf]  ;;  %v4102_v41 = vld [vmem:[#allocation8 + $0x174] sm:$0xf0]  ;;  %v3309_v43 = vor.u32 %v4086_v34, %v3308_v33  ;;  %v3364_v53 = vld [vmem:[#allocation8 + $0x160] sm:$0xf]  ;;  %v3301_v55 = vor.u32 %v4084_v48, %v3300_v47 }
  0x76   : > { %v3436_v45 = vld [vmem:[#allocation8 + $0x1f0] sm:$0xf]  ;;  %v4118_v46 = vld [vmem:[#allocation8 + $0x1f4] sm:$0xf0]  ;;  %v3373_v49 = vor.u32 %v4102_v41, %v3372_v40  ;;  %v4100_v54 = vld [vmem:[#allocation8 + $0x164] sm:$0xf0] }
  0x77   : > { %843 = vmatpush.bf16.msra.mxu0 %v3077_v16  ;;  %v3437_v51 = vor.u32 %v4118_v46, %v3436_v45  ;;  %v3228_v52 = vld [vmem:[#allocation8 + $0x50] sm:$0xf]  ;;  %v4066_v56 = vld [vmem:[#allocation8 + $0x54] sm:$0xf0]  ;;  %v3428_v57 = vld [vmem:[#allocation8 + $0x1e0] sm:$0xf]  ;;  %v3365_v61 = vor.u32 %v4100_v54, %v3364_v53 }
  0x78   : > { %861 = vmatpush.bf16.msra.mxu1 %v3081_v19  ;;  %v4116_v58 = vld [vmem:[#allocation8 + $0x1e4] sm:$0xf0]  ;;  %v3292_v59 = vld [vmem:[#allocation8 + $0xd0] sm:$0xf]  ;;  %v4082_v60 = vld [vmem:[#allocation8 + $0xd4] sm:$0xf0]  ;;  %v3229_v62 = vor.u32 %v4066_v56, %v3228_v52 }
  0x79   : > { %879 = vmatpush.bf16.msra.mxu2 %v3085_v20  ;;  %897 = vmatpush.bf16.msra.mxu3 %v3089_v24  ;;  %v3429_v63 = vor.u32 %v4116_v58, %v3428_v57  ;;  %v3220_v0 = vld [vmem:[#allocation8 + $0x40] sm:$0xf]  ;;  %v3356_v1 = vld [vmem:[#allocation8 + $0x150] sm:$0xf]  ;;  %v4098_v2 = vld [vmem:[#allocation8 + $0x154] sm:$0xf0]  ;;  %v3293_v3 = vor.u32 %v4082_v60, %v3292_v59 }
  0x7a   : > { %v4064_v4 = vld [vmem:[#allocation8 + $0x44] sm:$0xf0]  ;;  %v3420_v5 = vld [vmem:[#allocation8 + $0x1d0] sm:$0xf]  ;;  %v4114_v6 = vld [vmem:[#allocation8 + $0x1d4] sm:$0xf0]  ;;  %v3357_v9 = vor.u32 %v4098_v2, %v3356_v1 }
  0x7b   : > { %844 = vmatpush.bf16.msra.mxu0 %v3061_v31  ;;  %v3284_v7 = vld [vmem:[#allocation8 + $0xc0] sm:$0xf]  ;;  %v4080_v8 = vld [vmem:[#allocation8 + $0xc4] sm:$0xf0]  ;;  %v3221_v10 = vor.u32 %v4064_v4, %v3220_v0  ;;  %v3421_v11 = vor.u32 %v4114_v6, %v3420_v5  ;;  %v3212_v15 = vld [vmem:[#allocation8 + $0x30] sm:$0xf] }
  0x7c   : > { %862 = vmatpush.bf16.msra.mxu1 %v3065_v35  ;;  %v3285_v12 = vor.u32 %v4080_v8, %v3284_v7  ;;  %v632_v13 = vld [vmem:[%s5050_s24 + $0x10] sm:$0xff]  ;;  %v3276_v17 = vld [vmem:[#allocation8 + $0xb0] sm:$0xf]  ;;  %v4096_v22 = vld [vmem:[#allocation8 + $0x144] sm:$0xf0]  ;;  %s2835_s3 = sshll.u32 %s5131_s13, 4  ;;  %s2836_s3 = int_to_ptr.vmem [resolvable:$true] %s2835_s3 }
  0x7d   : > { %880 = vmatpush.bf16.msra.mxu2 %v3069_v36  ;;  %898 = vmatpush.bf16.msra.mxu3 %v3073_v37  ;;  %v634_v14 = vpack.c.bf16 %v632_v13, %v632_v13  ;;  %v4062_v16 = vld [vmem:[#allocation8 + $0x34] sm:$0xf0]  ;;  %v3348_v21 = vld [vmem:[#allocation8 + $0x140] sm:$0xf]  ;;  %v4112_v25 = vld [vmem:[#allocation8 + $0x1c4] sm:$0xf0] }
  0x7e   : > { %845 = vmatmul.bf16.vlgmr.msra.gmra.mxu0 %v633_v42  ;;  %v3213_v18 = vor.u32 %v4062_v16, %v3212_v15  ;;  %v4078_v19 = vld [vmem:[#allocation8 + $0xb4] sm:$0xf0]  ;;  %v3412_v23 = vld [vmem:[#allocation8 + $0x1c0] sm:$0xf]  ;;  %v3349_v24 = vor.u32 %v4096_v22, %v3348_v21  ;;  %v4060_v28 = vld [vmem:[#allocation8 + $0x24] sm:$0xf0] }
  0x7f   : > { %1319 = vmatpush.bf16.msrb.mxu0 %v3245_v38  ;;  %863 = vmatmul.bf16.vlgmr.msra.gmra.mxu1 %v633_v42  ;;  %v3277_v20 = vor.u32 %v4078_v19, %v3276_v17  ;;  %v3413_v26 = vor.u32 %v4112_v25, %v3412_v23  ;;  %v3204_v27 = vld [vmem:[#allocation8 + $0x20] sm:$0xf]  ;;  %v4076_v31 = vld [vmem:[#allocation8 + $0xa4] sm:$0xf0]  ;;  %v3340_v32 = vld [vmem:[#allocation8 + $0x130] sm:$0xf] }
  0x80   : > { %1337 = vmatpush.bf16.msrb.mxu1 %v3309_v43  ;;  %881 = vmatmul.bf16.vlgmr.msra.gmra.mxu2 %v633_v42  ;;  %v3205_v29 = vor.u32 %v4060_v28, %v3204_v27  ;;  %v3268_v30 = vld [vmem:[#allocation8 + $0xa0] sm:$0xf]  ;;  %v4094_v34 = vld [vmem:[#allocation8 + $0x134] sm:$0xf0]  ;;  %v3404_v35 = vld [vmem:[#allocation8 + $0x1b0] sm:$0xf] }
  0x81   : > { %899 = vmatmul.bf16.vlgmr.msra.gmra.mxu3 %v633_v42  ;;  %1355 = vmatpush.bf16.msrb.mxu2 %v3373_v49  ;;  %v3269_v33 = vor.u32 %v4076_v31, %v3268_v30  ;;  %v3341_v36 = vor.u32 %v4094_v34, %v3340_v32  ;;  %v4110_v37 = vld [vmem:[#allocation8 + $0x1b4] sm:$0xf0]  ;;  %v3196_v39 = vld [vmem:[#allocation8 + $0x10] sm:$0xf]  ;;  %v3332_v45 = vld [vmem:[#allocation8 + $0x120] sm:$0xf] }
  0x82   : > { %1373 = vmatpush.bf16.msrb.mxu3 %v3437_v51  ;;  %v3405_v38 = vor.u32 %v4110_v37, %v3404_v35  ;;  %v4058_v40 = vld [vmem:[#allocation8 + $0x14] sm:$0xf0]  ;;  %v3260_v41 = vld [vmem:[#allocation8 + $0x90] sm:$0xf]  ;;  %v4092_v46 = vld [vmem:[#allocation8 + $0x124] sm:$0xf0] }
  0x83   : > { %1320 = vmatpush.bf16.msrb.mxu0 %v3237_v50  ;;  %v3197_v42 = vor.u32 %v4058_v40, %v3196_v39  ;;  %v4074_v43 = vld [vmem:[#allocation8 + $0x94] sm:$0xf0]  ;;  %v3333_v47 = vor.u32 %v4092_v46, %v3332_v45  ;;  %v3396_v48 = vld [vmem:[#allocation8 + $0x1a0] sm:$0xf]  ;;  %v4108_v49 = vld [vmem:[#allocation8 + $0x1a4] sm:$0xf0] }
  0x84   : > { %1338 = vmatpush.bf16.msrb.mxu1 %v3301_v55  ;;  %v3261_v44 = vor.u32 %v4074_v43, %v3260_v41  ;;  %v3397_v50 = vor.u32 %v4108_v49, %v3396_v48  ;;  %v3188_v51 = vld [vmem:[#allocation8] sm:$0xf]  ;;  %v4056_v52 = vld [vmem:[#allocation8 + $0x4] sm:$0xf0]  ;;  %v3324_v56 = vld [vmem:[#allocation8 + $0x110] sm:$0xf] }
  0x85   : > { %1356 = vmatpush.bf16.msrb.mxu2 %v3365_v61  ;;  %v3252_v53 = vld [vmem:[#allocation8 + $0x80] sm:$0xf]  ;;  %v3189_v54 = vor.u32 %v4056_v52, %v3188_v51  ;;  %v4072_v55 = vld [vmem:[#allocation8 + $0x84] sm:$0xf0]  ;;  %v4090_v57 = vld [vmem:[#allocation8 + $0x114] sm:$0xf0] }
  0x86   : > { %1374 = vmatpush.bf16.msrb.mxu3 %v3429_v63  ;;  %v3253_v58 = vor.u32 %v4072_v55, %v3252_v53  ;;  %v3325_v59 = vor.u32 %v4090_v57, %v3324_v56  ;;  %v3388_v60 = vld [vmem:[#allocation8 + $0x190] sm:$0xf]  ;;  %v4106_v61 = vld [vmem:[#allocation8 + $0x194] sm:$0xf0]  ;;  %v4069_v63 = vld [vmem:[#allocation8 + $0x74] sm:$0xf] }
  0x87   : > { %1321 = vmatpush.bf16.msrb.mxu0 %v3229_v62  ;;  %v3389_v62 = vor.u32 %v4106_v61, %v3388_v60  ;;  %v3246_v0 = vld [vmem:[#allocation8 + $0x78] sm:$0xf0]  ;;  %v4085_v1 = vld [vmem:[#allocation8 + $0xf4] sm:$0xf]  ;;  %v3316_v5 = vld [vmem:[#allocation8 + $0x100] sm:$0xf] }
  0x88   : > { %1339 = vmatpush.bf16.msrb.mxu1 %v3293_v3  ;;  %v3249_v2 = vor.u32 %v4069_v63, %v3246_v0  ;;  %v3310_v3 = vld [vmem:[#allocation8 + $0xf8] sm:$0xf0]  ;;  %v4088_v6 = vld [vmem:[#allocation8 + $0x104] sm:$0xf0]  ;;  %v3380_v7 = vld [vmem:[#allocation8 + $0x180] sm:$0xf] }
  0x89   : > { %1357 = vmatpush.bf16.msrb.mxu2 %v3357_v9  ;;  %v3313_v4 = vor.u32 %v4085_v1, %v3310_v3  ;;  %v3317_v8 = vor.u32 %v4088_v6, %v3316_v5  ;;  %v4104_v9 = vld [vmem:[#allocation8 + $0x184] sm:$0xf0]  ;;  %v4083_v13 = vld [vmem:[#allocation8 + $0xe4] sm:$0xf]  ;;  %v3302_v15 = vld [vmem:[#allocation8 + $0xe8] sm:$0xf0] }
  0x8a   : > { %1375 = vmatpush.bf16.msrb.mxu3 %v3421_v11  ;;  %v4067_v11 = vld [vmem:[#allocation8 + $0x64] sm:$0xf]  ;;  %v3305_v16 = vor.u32 %v4083_v13, %v3302_v15  ;;  %v4101_v17 = vld [vmem:[#allocation8 + $0x174] sm:$0xf]  ;;  %v3438_v21 = vld [vmem:[#allocation8 + $0x1f8] sm:$0xf0] }
  0x8b   : > { %1322 = vmatpush.bf16.msrb.mxu0 %v3221_v10  ;;  %v3381_v10 = vor.u32 %v4104_v9, %v3380_v7  ;;  %v4117_v19 = vld [vmem:[#allocation8 + $0x1f4] sm:$0xf]  ;;  %v3294_v27 = vld [vmem:[#allocation8 + $0xd8] sm:$0xf0]  ;;  %v3366_v30 = vld [vmem:[#allocation8 + $0x168] sm:$0xf0] }
  0x8c   : > { %1340 = vmatpush.bf16.msrb.mxu1 %v3285_v12  ;;  %v3238_v12 = vld [vmem:[#allocation8 + $0x68] sm:$0xf0]  ;;  %v3441_v22 = vor.u32 %v4117_v19, %v3438_v21  ;;  %v4065_v23 = vld [vmem:[#allocation8 + $0x54] sm:$0xf]  ;;  %v4115_v31 = vld [vmem:[#allocation8 + $0x1e4] sm:$0xf] }
  0x8d   : > { %1358 = vmatpush.bf16.msrb.mxu2 %v3349_v24  ;;  %v3230_v24 = vld [vmem:[#allocation8 + $0x58] sm:$0xf0]  ;;  %v4081_v25 = vld [vmem:[#allocation8 + $0xd4] sm:$0xf]  ;;  %v4063_v35 = vld [vmem:[#allocation8 + $0x44] sm:$0xf] }
  0x8e   : > { %850 = vmatmul.bf16.gmra.mxu0 %v634_v14  ;;  %1376 = vmatpush.bf16.msrb.mxu3 %v3413_v26  ;;  %v3233_v26 = vor.u32 %v4065_v23, %v3230_v24  ;;  %v3297_v28 = vor.u32 %v4081_v25, %v3294_v27  ;;  %v4079_v37 = vld [vmem:[#allocation8 + $0xc4] sm:$0xf]  ;;  %v3286_v39 = vld [vmem:[#allocation8 + $0xc8] sm:$0xf0]  ;;  %v4097_v40 = vld [vmem:[#allocation8 + $0x154] sm:$0xf] }
  0x8f   : > { %868 = vmatmul.bf16.gmra.mxu1 %v634_v14  ;;  %1323 = vmatpush.bf16.msrb.mxu0 %v3213_v18  ;;  %v3374_v18 = vld [vmem:[#allocation8 + $0x178] sm:$0xf0]  ;;  %v3289_v43 = vor.u32 %v4079_v37, %v3286_v39  ;;  %v4113_v45 = vld [vmem:[#allocation8 + $0x1d4] sm:$0xf]  ;;  %v4095_v56 = vld [vmem:[#allocation8 + $0x144] sm:$0xf] }
  0x90   : > { %886 = vmatmul.bf16.gmra.mxu2 %v634_v14  ;;  %1341 = vmatpush.bf16.msrb.mxu1 %v3277_v20  ;;  %v3377_v20 = vor.u32 %v4101_v17, %v3374_v18  ;;  %v3358_v41 = vld [vmem:[#allocation8 + $0x158] sm:$0xf0]  ;;  %v4077_v52 = vld [vmem:[#allocation8 + $0xb4] sm:$0xf]  ;;  %v3350_v57 = vld [vmem:[#allocation8 + $0x148] sm:$0xf0] }
  0x91   : > { %904 = vmatmul.bf16.gmra.mxu3 %v634_v14  ;;  %1359 = vmatpush.bf16.msrb.mxu2 %v3341_v36  ;;  %v3241_v14 = vor.u32 %v4067_v11, %v3238_v12  ;;  %v3222_v36 = vld [vmem:[#allocation8 + $0x48] sm:$0xf0]  ;;  %v3422_v46 = vld [vmem:[#allocation8 + $0x1d8] sm:$0xf0]  ;;  %v3353_v60 = vor.u32 %v4095_v56, %v3350_v57  ;;  %v4111_v61 = vld [vmem:[#allocation8 + $0x1c4] sm:$0xf] }
  0x92   : > { %1377 = vmatpush.bf16.msrb.mxu3 %v3405_v38  ;;  %v3225_v38 = vor.u32 %v4063_v35, %v3222_v36  ;;  %v3425_v49 = vor.u32 %v4113_v45, %v3422_v46  ;;  %v3214_v51 = vld [vmem:[#allocation8 + $0x38] sm:$0xf0]  ;;  %v4059_v63 = vld [vmem:[#allocation8 + $0x24] sm:$0xf]  ;;  %v4093_v7 = vld [vmem:[#allocation8 + $0x134] sm:$0xf] }
  0x93   : > { %1324 = vmatpush.bf16.msrb.mxu0 %v3205_v29  ;;  %v4099_v29 = vld [vmem:[#allocation8 + $0x164] sm:$0xf]  ;;  %v3278_v55 = vld [vmem:[#allocation8 + $0xb8] sm:$0xf0]  ;;  %v4109_v9 = vld [vmem:[#allocation8 + $0x1b4] sm:$0xf] }
  0x94   : > { %1342 = vmatpush.bf16.msrb.mxu1 %v3269_v33  ;;  %v3369_v32 = vor.u32 %v4099_v29, %v3366_v30  ;;  %v3430_v33 = vld [vmem:[#allocation8 + $0x1e8] sm:$0xf0]  ;;  %v4075_v3 = vld [vmem:[#allocation8 + $0xa4] sm:$0xf]  ;;  %v3406_v13 = vld [vmem:[#allocation8 + $0x1b8] sm:$0xf0] }
  0x95   : > { %1360 = vmatpush.bf16.msrb.mxu2 %v3333_v47  ;;  %v3433_v34 = vor.u32 %v4115_v31, %v3430_v33  ;;  %v3409_v15 = vor.u32 %v4109_v9, %v3406_v13  ;;  %v3198_v17 = vld [vmem:[#allocation8 + $0x18] sm:$0xf0]  ;;  %v4073_v18 = vld [vmem:[#allocation8 + $0x94] sm:$0xf]  ;;  %v4091_v23 = vld [vmem:[#allocation8 + $0x124] sm:$0xf] }
  0x96   : > { %1378 = vmatpush.bf16.msrb.mxu3 %v3397_v50  ;;  %v4061_v50 = vld [vmem:[#allocation8 + $0x34] sm:$0xf]  ;;  %v3334_v24 = vld [vmem:[#allocation8 + $0x128] sm:$0xf0]  ;;  %v4107_v29 = vld [vmem:[#allocation8 + $0x1a4] sm:$0xf] }
  0x97   : > { %1325 = vmatpush.bf16.msrb.mxu0 %v3197_v42  ;;  %v5075_v42 = vld [vmem:[#allocation7] sm:$0xf]  ;;  %v3398_v30 = vld [vmem:[#allocation8 + $0x1a8] sm:$0xf0]  ;;  %v4055_v31 = vld [vmem:[#allocation8 + $0x4] sm:$0xf] }
  0x98   : > { %1343 = vmatpush.bf16.msrb.mxu1 %v3261_v44  ;;  %v3361_v44 = vor.u32 %v4097_v40, %v3358_v41  ;;  %v5078_v47 = vperm.slane %v5075_v42, 0  ;;  %v5081_v48 = vperm.slane %v5075_v42, 1  ;;  %v671_v33 = vperm.slane %v5075_v42, 2  ;;  %v3190_v36 = vld [vmem:[#allocation8 + $0x8] sm:$0xf0]  ;;  %s4263_s25 = smul.u32 24, %s4926_s20 }
  0x99   : > { %1361 = vmatpush.bf16.msrb.mxu2 %v3325_v59  ;;  %v3281_v59 = vor.u32 %v4077_v52, %v3278_v55  ;;  %v3401_v35 = vor.u32 %v4107_v29, %v3398_v30  ;;  %v4071_v37 = vld [vmem:[#allocation8 + $0x84] sm:$0xf]  ;;  %v3193_v40 = vor.u32 %v4055_v31, %v3190_v36  ;;  %v3254_v41 = vld [vmem:[#allocation8 + $0x88] sm:$0xf0]  ;;  %v3326_v46 = vld [vmem:[#allocation8 + $0x118] sm:$0xf0] }
  0x9a   : > { %1379 = vmatpush.bf16.msrb.mxu3 %v3389_v62  ;;  %v3414_v62 = vld [vmem:[#allocation8 + $0x1c8] sm:$0xf0]  ;;  %v3257_v45 = vor.u32 %v4071_v37, %v3254_v41  ;;  %v3390_v52 = vld [vmem:[#allocation8 + $0x198] sm:$0xf0]  ;;  %v3556_v30 = vld [vmem:[#allocation11 + $0x60] sm:$0xf] }
  0x9b   : > { %1326 = vmatpush.bf16.msrb.mxu0 %v3189_v54  ;;  %v3217_v54 = vor.u32 %v4061_v50, %v3214_v51  ;;  %v3417_v1 = vor.u32 %v4111_v61, %v3414_v62  ;;  %v3318_v61 = vld [vmem:[#allocation8 + $0x108] sm:$0xf0]  ;;  %v4103_v62 = vld [vmem:[#allocation8 + $0x184] sm:$0xf]  ;;  %v4148_v31 = vld [vmem:[#allocation11 + $0x64] sm:$0xf0] }
  0x9c   : > { %1344 = vmatpush.bf16.msrb.mxu1 %v3253_v58  ;;  %v4124_v36 = vld [vmem:[#allocation10 + $0x28] sm:$0xff]  ;;  %s5284_s9 = sld [smem:[#allocation35_spill]]  ;;  %s2818_s21 = scalar_lea.sflag [#allocation4], %s5043_s2 }
  0x9d   : > { %1362 = vmatpush.bf16.msrb.mxu2 %v3317_v8  ;;  %v3342_v8 = vld [vmem:[#allocation8 + $0x138] sm:$0xf0] }
  0x9e   : > { %1380 = vmatpush.bf16.msrb.mxu3 %v3381_v10  ;;  %v3345_v12 = vor.u32 %v4093_v7, %v3342_v8 }
  0x9f   : > { %1391 = vmatpush.bf16.msra.mxu0 %v3249_v2  ;;  %v3206_v2 = vld [vmem:[#allocation8 + $0x28] sm:$0xf0] }
  0xa0   : > { %1409 = vmatpush.bf16.msra.mxu1 %v3313_v4  ;;  %v3270_v4 = vld [vmem:[#allocation8 + $0xa8] sm:$0xf0]  ;;  %v3209_v5 = vor.u32 %v4059_v63, %v3206_v2 }
  0xa1   : > { %1427 = vmatpush.bf16.msra.mxu2 %v3377_v20  ;;  %v3273_v6 = vor.u32 %v4075_v3, %v3270_v4  ;;  %v3382_v2 = vld [vmem:[#allocation8 + $0x188] sm:$0xf0] }
  0xa2   : > { %1445 = vmatpush.bf16.msra.mxu3 %v3441_v22  ;;  %v3262_v22 = vld [vmem:[#allocation8 + $0x98] sm:$0xf0]  ;;  %s2834_s5 = scalar_lea.hbm %s5284_s9, %s4263_s25 }
  0xa3   : > { %1392 = vmatpush.bf16.msra.mxu0 %v3241_v14  ;;  %v3265_v27 = vor.u32 %v4073_v18, %v3262_v22  ;;  %s2837_s24 = sshll.u32 %s2834_s5, 4  ;;  %s2838_s24 = int_to_ptr.hbm [resolvable:$true] %s2837_s24 }
  0xa4   : > { %1410 = vmatpush.bf16.msra.mxu1 %v3305_v16  ;;  %v4057_v16 = vld [vmem:[#allocation8 + $0x14] sm:$0xf]  ;;  %s4709_s7 = sshra.s32 %s2838_s24, 4  ;;  %s4710_s7 = int_to_ptr.hbm [resolvable:$true] %s4709_s7 }
  0xa5   : > { %1428 = vmatpush.bf16.msra.mxu2 %v3369_v32  ;;  %v3201_v21 = vor.u32 %v4057_v16, %v3198_v17  ;;  %s4711_s17 = scalar_lea.hbm %s4710_s7, 24  ;;  %p4716_p12 = scmp.lt.s32.totalorder %s4710_s7, %s5284_s9 }
  0xa6   : > { %1446 = vmatpush.bf16.msra.mxu3 %v3433_v34  ;;  %p4712_p1 = scmp.ne.s32.totalorder %s4710_s7, %s4711_s17 }
  0xa7   : > { %1393 = vmatpush.bf16.msra.mxu0 %v3233_v26 }
  0xa8   : > { %1411 = vmatpush.bf16.msra.mxu1 %v3297_v28  ;;  %v3337_v28 = vor.u32 %v4091_v23, %v3334_v24  ;;  %p4713_p3 = pnand %p4712_p1, %p5011_p4 }
  0xa9   : > { %1429 = vmatpush.bf16.msra.mxu2 %v3361_v44 }
  0xaa   : > { %1447 = vmatpush.bf16.msra.mxu3 %v3425_v49  ;;  %v4105_v49 = vld [vmem:[#allocation8 + $0x194] sm:$0xf]  ;;  %p4714_p5 = pneg %p4713_p3 }
  0xab   : > { %1394 = vmatpush.bf16.msra.mxu0 %v3225_v38  ;;  %v672_v38 = vperm.slane %v5075_v42, 3  ;;  %v3393_v55 = vor.u32 %v4105_v49, %v3390_v52  ;;  %v3524_v49 = vld [vmem:[#allocation11 + $0x20] sm:$0xf] }
  0xac   : > { %1412 = vmatpush.bf16.msra.mxu1 %v3289_v43  ;;  %v4089_v43 = vld [vmem:[#allocation8 + $0x114] sm:$0xf] }
  0xad   : > { %1430 = vmatpush.bf16.msra.mxu2 %v3353_v60  ;;  %v3329_v51 = vor.u32 %v4089_v43, %v3326_v46  ;;  %v4087_v60 = vld [vmem:[#allocation8 + $0x104] sm:$0xf]  ;;  %v3532_v43 = vld [vmem:[#allocation11 + $0x30] sm:$0xf] }
  0xae   : > { %1448 = vmatpush.bf16.msra.mxu3 %v3417_v1  ;;  %v3321_v1 = vor.u32 %v4087_v60, %v3318_v61  ;;  %v3628_v60 = vld [vmem:[#allocation11 + $0xf0] sm:$0xf]  ;;  %v4166_v61 = vld [vmem:[#allocation11 + $0xf4] sm:$0xf0] }
  0xaf   : > { %1395 = vmatpush.bf16.msra.mxu0 %v3217_v54 }
  0xb0   : > { %1413 = vmatpush.bf16.msra.mxu1 %v3281_v59 }
  0xb1   : > { %1431 = vmatpush.bf16.msra.mxu2 %v3345_v12 }
  0xb2   : > { %1449 = vmatpush.bf16.msra.mxu3 %v3409_v15 }
  0xb3   : > { %1396 = vmatpush.bf16.msra.mxu0 %v3209_v5  ;;  %v3385_v5 = vor.u32 %v4103_v62, %v3382_v2  ;;  %v4149_v62 = vld [vmem:[#allocation11 + $0x74] sm:$0xf] }
  0xb4   : > { %1414 = vmatpush.bf16.msra.mxu1 %v3273_v6 }
  0xb5   : > { %1432 = vmatpush.bf16.msra.mxu2 %v3337_v28  ;;  %v4150_v28 = vld [vmem:[#allocation11 + $0x74] sm:$0xf0] }
  0xb6   : > { %1450 = vmatpush.bf16.msra.mxu3 %v3401_v35  ;;  %v4146_v35 = vld [vmem:[#allocation11 + $0x54] sm:$0xf0] }
  0xb7   : > { %1397 = vmatpush.bf16.msra.mxu0 %v3201_v21 }
  0xb8   : > { %1415 = vmatpush.bf16.msra.mxu1 %v3265_v27  ;;  %v3564_v27 = vld [vmem:[#allocation11 + $0x70] sm:$0xf] }
  0xb9   : > { %1433 = vmatpush.bf16.msra.mxu2 %v3329_v51  ;;  %v3565_v29 = vor.u32 %v4150_v28, %v3564_v27  ;;  %v4121_v51 = vld [vmem:[#allocation10 + $0x10] sm:$0xff] }
  0xba   : > { %1451 = vmatpush.bf16.msra.mxu3 %v3393_v55  ;;  %v4120_v55 = vld [vmem:[#allocation10 + $0x8] sm:$0xff] }
  0xbb   : > { %1398 = vmatpush.bf16.msra.mxu0 %v3193_v40  ;;  %v4123_v40 = vld [vmem:[#allocation10 + $0x20] sm:$0xff] }
  0xbc   : > { %1416 = vmatpush.bf16.msra.mxu1 %v3257_v45  ;;  %v4122_v45 = vld [vmem:[#allocation10 + $0x18] sm:$0xff] }
  0xbd   : > { %1434 = vmatpush.bf16.msra.mxu2 %v3321_v1  ;;  %v3566_v1 = vld [vmem:[#allocation11 + $0x78] sm:$0xf0] }
  0xbe   : > { %1452 = vmatpush.bf16.msra.mxu3 %v3385_v5  ;;  %v3569_v2 = vor.u32 %v4149_v62, %v3566_v1  ;;  %v3620_v5 = vld [vmem:[#allocation11 + $0xe0] sm:$0xf]  ;;  %v3518_v62 = vld [vmem:[#allocation11 + $0x18] sm:$0xf0] }
  0xfb   : > { %v846_v53 = vpop.f32.mrf.mxu0 }
  0xfc   : > { %v864_v58 = vpop.f32.mrf.mxu1  ;;  %v847_v0 = vadd.f32 %v846_v53, %v5078_v47 }
  0xfd   : > { %v865_v11 = vadd.f32 %v864_v58, %v5081_v48 }
  0xfe   : > { %v909_v10 = vmax.f32 %v847_v0, 0.0 }
  0xff   : > { %v910_v32 = vmax.f32 %v865_v11, 0.0 }
 0x103   : > { %v882_v14 = vpop.f32.mrf.mxu2  ;;  %v848_v20 = vpop.f32.mrf.mxu0 }
 0x104   : > { %v900_v19 = vpop.f32.mrf.mxu3  ;;  %v849_v25 = vadd.f32 %v848_v20, %v5078_v47  ;;  %v866_v26 = vpop.f32.mrf.mxu1  ;;  %v883_v53 = vadd.f32 %v882_v14, %v671_v33 }
 0x105   : > { %v867_v34 = vadd.f32 %v866_v26, %v5081_v48  ;;  %v901_v42 = vadd.f32 %v900_v19, %v672_v38  ;;  %v4126_v26 = vld [vmem:[#allocation10 + $0x38] sm:$0xff] }
 0x106   : > { %v913_v39 = vmax.f32 %v849_v25, 0.0  ;;  %v911_v3 = vmax.f32 %v883_v53, 0.0  ;;  %v3516_v53 = vld [vmem:[#allocation11 + $0x10] sm:$0xf] }
 0x107   : > { %v914_v44 = vmax.f32 %v867_v34, 0.0  ;;  %v912_v6 = vmax.f32 %v901_v42, 0.0  ;;  %v3548_v34 = vld [vmem:[#allocation11 + $0x50] sm:$0xf] }
 0x108   : > { %v5089_v50 = vpack.c.bf16 %v913_v39, %v909_v10  ;;  %v3549_v37 = vor.u32 %v4146_v35, %v3548_v34  ;;  %v4144_v39 = vld [vmem:[#allocation11 + $0x44] sm:$0xf0]  ;;  %v4130_v34 = vld [vmem:[#allocation10 + $0x58] sm:$0xff] }
 0x109   : > { %v922_v54 = vpack.c.bf16 %v914_v44, %v910_v32  ;;  %v4125_v32 = vld [vmem:[#allocation10 + $0x30] sm:$0xff]  ;;  %v4142_v44 = vld [vmem:[#allocation11 + $0x34] sm:$0xf0] }
 0x10a   : > { %1327 = vmatmul.bf16.vlgmr.msrb.gmra.mxu0 %v5089_v50  ;;  %v3533_v46 = vor.u32 %v4142_v44, %v3532_v43  ;;  %v3588_v43 = vld [vmem:[#allocation11 + $0xa0] sm:$0xf]  ;;  %v4156_v44 = vld [vmem:[#allocation11 + $0xa4] sm:$0xf0] }
 0x10b   : > { %v884_v56 = vpop.f32.mrf.mxu2  ;;  %1345 = vmatmul.bf16.vlgmr.msrb.gmra.mxu1 %v922_v54  ;;  %v851_v59 = vpop.f32.mrf.mxu0  ;;  %1605 = vmatpush.bf16.msrb.mxu0 %v4126_v26  ;;  %v3542_v26 = vld [vmem:[#allocation11 + $0x48] sm:$0xf0] }
 0x10c   : > { %v885_v57 = vadd.f32 %v884_v56, %v671_v33  ;;  %v902_v58 = vpop.f32.mrf.mxu3  ;;  %v869_v0 = vpop.f32.mrf.mxu1  ;;  %v852_v8 = vadd.f32 %v851_v59, %v5078_v47  ;;  %v3508_v56 = vld [vmem:[#allocation11] sm:$0xf] }
 0x10d   : > { %v903_v63 = vadd.f32 %v902_v58, %v672_v38  ;;  %v870_v10 = vadd.f32 %v869_v0, %v5081_v48  ;;  %v4119_v58 = vld [vmem:[#allocation10] sm:$0xff]  ;;  %v3629_v0 = vor.u32 %v4166_v61, %v3628_v60  ;;  %v4128_v60 = vld [vmem:[#allocation10 + $0x48] sm:$0xff] }
 0x10e   : > { %v915_v4 = vmax.f32 %v885_v57, 0.0  ;;  %v917_v13 = vmax.f32 %v852_v8, 0.0  ;;  %v4136_v57 = vld [vmem:[#allocation11 + $0x4] sm:$0xf0] }
 0x10f   : > { %v916_v7 = vmax.f32 %v903_v63, 0.0  ;;  %v918_v14 = vmax.f32 %v870_v10, 0.0  ;;  %1606 = vmatpush.bf16.msrb.mxu0 %v4125_v32  ;;  %v3509_v59 = vor.u32 %v4136_v57, %v3508_v56  ;;  %v4134_v63 = vld [vmem:[#allocation10 + $0x78] sm:$0xff]  ;;  %v3558_v10 = vld [vmem:[#allocation11 + $0x68] sm:$0xf0] }
 0x110   : > { %v923_v9 = vpack.c.bf16 %v915_v4, %v911_v3  ;;  %v925_v20 = vpack.c.bf16 %v917_v13, %v917_v13  ;;  %1623 = vmatpush.bf16.msrb.mxu1 %v4134_v63  ;;  %v3612_v13 = vld [vmem:[#allocation11 + $0xd0] sm:$0xf]  ;;  %v4141_v32 = vld [vmem:[#allocation11 + $0x34] sm:$0xf] }
 0x111   : > { %v924_v11 = vpack.c.bf16 %v916_v7, %v912_v6  ;;  %v926_v21 = vpack.c.bf16 %v918_v14, %v918_v14  ;;  %v4164_v6 = vld [vmem:[#allocation11 + $0xe4] sm:$0xf0]  ;;  %v4133_v7 = vld [vmem:[#allocation10 + $0x70] sm:$0xff]  ;;  %v4162_v14 = vld [vmem:[#allocation11 + $0xd4] sm:$0xf0] }
 0x112   : > { %1363 = vmatmul.bf16.vlgmr.msrb.gmra.mxu2 %v923_v9  ;;  %v3621_v8 = vor.u32 %v4164_v6, %v3620_v5  ;;  %v4137_v56 = vld [vmem:[#allocation11 + $0x14] sm:$0xf]  ;;  %v4152_v5 = vld [vmem:[#allocation11 + $0x84] sm:$0xf0]  ;;  %v4135_v6 = vld [vmem:[#allocation11 + $0x4] sm:$0xf] }
 0x113   : > { %1381 = vmatmul.bf16.vlgmr.msrb.gmra.mxu3 %v924_v11  ;;  %v887_v12 = vpop.f32.mrf.mxu2  ;;  %v853_v16 = vpop.f32.mrf.mxu0  ;;  %1842 = vmatpush.bf16.msrb.mxu2 %v3565_v29  ;;  %v3521_v63 = vor.u32 %v4137_v56, %v3518_v62 }
 0x114   : > { %v905_v15 = vpop.f32.mrf.mxu3  ;;  %v871_v17 = vpop.f32.mrf.mxu1  ;;  %v888_v18 = vadd.f32 %v887_v12, %v671_v33  ;;  %v3557_v33 = vor.u32 %v4148_v31, %v3556_v30  ;;  %1607 = vmatpush.bf16.msrb.mxu0 %v4124_v36  ;;  %1860 = vmatpush.bf16.msrb.mxu3 %v3629_v0  ;;  %v5098_v12 = vld [vmem:[%s5244_s4] sm:$0x3]  ;;  %v3596_v30 = vld [vmem:[#allocation11 + $0xb0] sm:$0xf]  ;;  %v4158_v31 = vld [vmem:[#allocation11 + $0xb4] sm:$0xf0] }
 0x115   : > { %v906_v19 = vadd.f32 %v905_v15, %v672_v38  ;;  %v3540_v38 = vld [vmem:[#allocation11 + $0x40] sm:$0xf]  ;;  %1624 = vmatpush.bf16.msrb.mxu1 %v4133_v7  ;;  %v4145_v15 = vld [vmem:[#allocation11 + $0x54] sm:$0xf]  ;;  %v4132_v16 = vld [vmem:[#allocation10 + $0x68] sm:$0xff]  ;;  %v3613_v17 = vor.u32 %v4162_v14, %v3612_v13  ;;  %v3597_v35 = vor.u32 %v4158_v31, %v3596_v30 }
 0x116   : > { %v919_v22 = vmax.f32 %v888_v18, 0.0  ;;  %v3541_v41 = vor.u32 %v4144_v39, %v3540_v38  ;;  %v3550_v18 = vld [vmem:[#allocation11 + $0x58] sm:$0xf0]  ;;  %v4159_v31 = vld [vmem:[#allocation11 + $0xc4] sm:$0xf] }
 0x117   : > { %v920_v47 = vmax.f32 %v906_v19, 0.0  ;;  %1843 = vmatpush.bf16.msrb.mxu2 %v3557_v33  ;;  %v3553_v19 = vor.u32 %v4145_v15, %v3550_v18  ;;  %v3534_v36 = vld [vmem:[#allocation11 + $0x38] sm:$0xf0] }
 0x118   : > { %v927_v24 = vpack.c.bf16 %v919_v22, %v919_v22  ;;  %1608 = vmatpush.bf16.msrb.mxu0 %v4123_v40  ;;  %1861 = vmatpush.bf16.msrb.mxu3 %v3621_v8  ;;  %v3630_v18 = vld [vmem:[#allocation11 + $0xf8] sm:$0xf0] }
 0x119   : > { %v928_v25 = vpack.c.bf16 %v920_v47, %v920_v47  ;;  %1625 = vmatpush.bf16.msrb.mxu1 %v4132_v16  ;;  %v3604_v47 = vld [vmem:[#allocation11 + $0xc0] sm:$0xf] }
 0x11a   : > { %1332 = vmatmul.bf16.gmra.mxu0 %v925_v20 }
 0x11b   : > { %v889_v23 = vpop.f32.mrf.mxu2  ;;  %1350 = vmatmul.bf16.gmra.mxu1 %v926_v21  ;;  %1844 = vmatpush.bf16.msrb.mxu2 %v3549_v37  ;;  %v3537_v37 = vor.u32 %v4141_v32, %v3534_v36  ;;  %v3606_v32 = vld [vmem:[#allocation11 + $0xc8] sm:$0xf0] }
 0x11c   : > { %v907_v48 = vpop.f32.mrf.mxu3  ;;  %1609 = vmatpush.bf16.msrb.mxu0 %v4122_v45  ;;  %1862 = vmatpush.bf16.msrb.mxu3 %v3613_v17  ;;  %v4160_v23 = vld [vmem:[#allocation11 + $0xc4] sm:$0xf0]  ;;  %v4139_v45 = vld [vmem:[#allocation11 + $0x24] sm:$0xf]  ;;  %v4165_v17 = vld [vmem:[#allocation11 + $0xf4] sm:$0xf]  ;;  %v3609_v36 = vor.u32 %v4159_v31, %v3606_v32 }
 0x11d   : > { %v4143_v48 = vld [vmem:[#allocation11 + $0x44] sm:$0xf]  ;;  %v3718_v32 = vld [vmem:[#allocation14 + $0xb0] sm:$0xf0] }
 0x11e   : > { %v3545_v27 = vor.u32 %v4143_v48, %v3542_v26  ;;  %v3622_v48 = vld [vmem:[#allocation11 + $0xe8] sm:$0xf0] }
 0x11f   : > { %1845 = vmatpush.bf16.msrb.mxu2 %v3541_v41 }
 0x120   : > { %1610 = vmatpush.bf16.msrb.mxu0 %v4121_v51  ;;  %v3526_v51 = vld [vmem:[#allocation11 + $0x28] sm:$0xf0] }
 0x122   : > { %1368 = vmatmul.bf16.gmra.mxu2 %v927_v24 }
 0x123   : > { %1386 = vmatmul.bf16.gmra.mxu3 %v928_v25  ;;  %1846 = vmatpush.bf16.msrb.mxu2 %v3533_v46 }
 0x124   : > { %1611 = vmatpush.bf16.msrb.mxu0 %v4120_v55  ;;  %v3580_v55 = vld [vmem:[#allocation11 + $0x90] sm:$0xf] }
 0x128   : > { %1612 = vmatpush.bf16.msrb.mxu0 %v4119_v58 }
 0x12a   : > { %1399 = vmatmul.bf16.vlgmr.msra.gmra.mxu0 %v5089_v50  ;;  %v4140_v50 = vld [vmem:[#allocation11 + $0x24] sm:$0xf0] }
 0x12b   : > { %1417 = vmatmul.bf16.vlgmr.msra.gmra.mxu1 %v922_v54  ;;  %v3525_v52 = vor.u32 %v4140_v50, %v3524_v49  ;;  %v4138_v54 = vld [vmem:[#allocation11 + $0x14] sm:$0xf0]  ;;  %v4129_v49 = vld [vmem:[#allocation10 + $0x50] sm:$0xff]  ;;  %v3589_v50 = vor.u32 %v4156_v44, %v3588_v43  ;;  %v3598_v43 = vld [vmem:[#allocation11 + $0xb8] sm:$0xf0] }
 0x12c   : > { %v3517_v42 = vor.u32 %v4138_v54, %v3516_v53  ;;  %1878 = vmatpush.bf16.msra.mxu0 %v3569_v2 }
 0x12d   : > { %1847 = vmatpush.bf16.msrb.mxu2 %v3525_v52  ;;  %v3529_v52 = vor.u32 %v4139_v45, %v3526_v51 }
 0x131   : > { %1848 = vmatpush.bf16.msrb.mxu2 %v3517_v42  ;;  %v4154_v42 = vld [vmem:[#allocation11 + $0x94] sm:$0xf0] }
 0x132   : > { %1435 = vmatmul.bf16.vlgmr.msra.gmra.mxu2 %v923_v9  ;;  %v4147_v9 = vld [vmem:[#allocation11 + $0x64] sm:$0xf]  ;;  %v3581_v61 = vor.u32 %v4154_v42, %v3580_v55  ;;  %v3582_v55 = vld [vmem:[#allocation11 + $0x98] sm:$0xf0] }
 0x133   : > { %1453 = vmatmul.bf16.vlgmr.msra.gmra.mxu3 %v924_v11  ;;  %v3561_v11 = vor.u32 %v4147_v9, %v3558_v10  ;;  %v4127_v9 = vld [vmem:[#allocation10 + $0x40] sm:$0xff] }
 0x135   : > { %1849 = vmatpush.bf16.msrb.mxu2 %v3509_v59  ;;  %1879 = vmatpush.bf16.msra.mxu0 %v3561_v11  ;;  %v3510_v11 = vld [vmem:[#allocation11 + $0x8] sm:$0xf0] }
 0x136   : > { %v3513_v13 = vor.u32 %v4135_v6, %v3510_v11 }
 0x139   : > { %1880 = vmatpush.bf16.msra.mxu0 %v3553_v19 }
 0x13a   : > { %1404 = vmatmul.bf16.gmra.mxu0 %v925_v20  ;;  %v995_v20 = vperm.slane %v5098_v12, 0 }
 0x13b   : > { %1422 = vmatmul.bf16.gmra.mxu1 %v926_v21 }
 0x13d   : > { %1881 = vmatpush.bf16.msra.mxu0 %v3545_v27  ;;  %v4161_v27 = vld [vmem:[#allocation11 + $0xd4] sm:$0xf] }
 0x141   : > { %1882 = vmatpush.bf16.msra.mxu0 %v3537_v37 }
 0x142   : > { %1440 = vmatmul.bf16.gmra.mxu2 %v927_v24  ;;  %v4131_v24 = vld [vmem:[#allocation10 + $0x60] sm:$0xff] }
 0x143   : > { %1458 = vmatmul.bf16.gmra.mxu3 %v928_v25  ;;  %v3605_v25 = vor.u32 %v4160_v23, %v3604_v47  ;;  %1626 = vmatpush.bf16.msrb.mxu1 %v4131_v24  ;;  %v4163_v23 = vld [vmem:[#allocation11 + $0xe4] sm:$0xf] }
 0x144   : > { %v3625_v24 = vor.u32 %v4163_v23, %v3622_v48  ;;  %v4193_v48 = vld [vmem:[#allocation14 + $0xcc] sm:$0xf0] }
 0x145   : > { %1863 = vmatpush.bf16.msrb.mxu3 %v3605_v25  ;;  %1883 = vmatpush.bf16.msra.mxu0 %v3529_v52 }
 0x147   : > { %1627 = vmatpush.bf16.msrb.mxu1 %v4130_v34  ;;  %v996_v34 = vperm.slane %v5098_v12, 1 }
 0x149   : > { %1864 = vmatpush.bf16.msrb.mxu3 %v3597_v35  ;;  %1884 = vmatpush.bf16.msra.mxu0 %v3521_v63 }
 0x14b   : > { %1628 = vmatpush.bf16.msrb.mxu1 %v4129_v49  ;;  %v3590_v49 = vld [vmem:[#allocation11 + $0xa8] sm:$0xf0] }
 0x14d   : > { %1865 = vmatpush.bf16.msrb.mxu3 %v3589_v50  ;;  %1885 = vmatpush.bf16.msra.mxu0 %v3513_v13 }
 0x14f   : > { %1629 = vmatpush.bf16.msrb.mxu1 %v4128_v60  ;;  %v3574_v60 = vld [vmem:[#allocation11 + $0x88] sm:$0xf0] }
 0x151   : > { %1866 = vmatpush.bf16.msrb.mxu3 %v3581_v61 }
 0x153   : > { %1630 = vmatpush.bf16.msrb.mxu1 %v4127_v9 }
 0x187   : > { %v1328_v3 = vpop.f32.mrf.mxu0 }
 0x188   : > { %v1346_v4 = vpop.f32.mrf.mxu1  ;;  %v1329_v28 = vadd.f32 %v1328_v3, %v995_v20 }
 0x18a   : > { %v1347_v38 = vadd.f32 %v1346_v4, %v1329_v28  ;;  %v3572_v4 = vld [vmem:[#allocation11 + $0x80] sm:$0xf]  ;;  %v3614_v28 = vld [vmem:[#allocation11 + $0xd8] sm:$0xf0] }
 0x18b   : > { %v3573_v10 = vor.u32 %v4152_v5, %v3572_v4  ;;  %v3617_v30 = vor.u32 %v4161_v27, %v3614_v28  ;;  %v3716_v28 = vld [vmem:[#allocation14 + $0xa0] sm:$0xf] }
 0x18d   : > { %1867 = vmatpush.bf16.msrb.mxu3 %v3573_v10 }
 0x18f   : > { %v1330_v21 = vpop.f32.mrf.mxu0 }
 0x190   : > { %v1348_v22 = vpop.f32.mrf.mxu1  ;;  %v1331_v39 = vadd.f32 %v1330_v21, %v995_v20 }
 0x192   : > { %v1349_v53 = vadd.f32 %v1348_v22, %v1331_v39 }
 0x195   : > { %v1364_v29 = vpop.f32.mrf.mxu2 }
 0x196   : > { %v1382_v33 = vpop.f32.mrf.mxu3  ;;  %v1365_v46 = vadd.f32 %v1364_v29, %v1347_v38 }
 0x197   : > { %v1333_v40 = vpop.f32.mrf.mxu0 }
 0x198   : > { %v1351_v41 = vpop.f32.mrf.mxu1  ;;  %v1383_v57 = vadd.f32 %v1382_v33, %v1365_v46  ;;  %v1334_v0 = vadd.f32 %v1333_v40, %v995_v20  ;;  %v3633_v20 = vor.u32 %v4165_v17, %v3630_v18  ;;  %v4155_v46 = vld [vmem:[#allocation11 + $0xa4] sm:$0xf] }
 0x199   : > { %v3593_v12 = vor.u32 %v4155_v46, %v3590_v49  ;;  %v3686_v46 = vld [vmem:[#allocation14 + $0x70] sm:$0xf0] }
 0x19a   : > { %v1463_v7 = vmax.f32 %v1383_v57, 0.0  ;;  %v1352_v14 = vadd.f32 %v1351_v41, %v1334_v0  ;;  %1896 = vmatpush.bf16.msra.mxu1 %v3633_v20  ;;  %v4157_v41 = vld [vmem:[#allocation11 + $0xb4] sm:$0xf] }
 0x19b   : > { %v3601_v45 = vor.u32 %v4157_v41, %v3598_v43  ;;  %v4197_v20 = vld [vmem:[#allocation14 + $0xec] sm:$0xf0]  ;;  %v3684_v41 = vld [vmem:[#allocation14 + $0x60] sm:$0xf] }
 0x19c   : > { %v4181_v43 = vld [vmem:[#allocation14 + $0x6c] sm:$0xf0] }
 0x19d   : > { %v1366_v54 = vpop.f32.mrf.mxu2 }
 0x19e   : > { %v1367_v58 = vadd.f32 %v1366_v54, %v1349_v53  ;;  %v1384_v59 = vpop.f32.mrf.mxu3  ;;  %1897 = vmatpush.bf16.msra.mxu1 %v3625_v24  ;;  %v4153_v54 = vld [vmem:[#allocation11 + $0x94] sm:$0xf]  ;;  %v4191_v24 = vld [vmem:[#allocation14 + $0xc4] sm:$0xf] }
 0x19f   : > { %v1335_v2 = vpop.f32.mrf.mxu0  ;;  %v3585_v57 = vor.u32 %v4153_v54, %v3582_v55  ;;  %v3670_v55 = vld [vmem:[#allocation14 + $0x50] sm:$0xf0] }
 0x1a0   : > { %v1385_v1 = vadd.f32 %v1384_v59, %v1367_v58  ;;  %v1353_v3 = vpop.f32.mrf.mxu1  ;;  %v4151_v59 = vld [vmem:[#allocation11 + $0x84] sm:$0xf] }
 0x1a1   : > { %v3577_v2 = vor.u32 %v4151_v59, %v3574_v60  ;;  %v3654_v60 = vld [vmem:[#allocation14 + $0x30] sm:$0xf0] }
 0x1a2   : > { %v1465_v8 = vmax.f32 %v1385_v1, 0.0  ;;  %1898 = vmatpush.bf16.msra.mxu1 %v3617_v30  ;;  %v4187_v30 = vld [vmem:[#allocation14 + $0xa4] sm:$0xf] }
 0x1a4   : > { %v5101_v15 = vpack.c.bf16 %v1465_v8, %v1463_v7 }
 0x1a5   : > { %v1369_v16 = vpop.f32.mrf.mxu2 }
 0x1a6   : > { %v1387_v19 = vpop.f32.mrf.mxu3  ;;  %1613 = vmatmul.bf16.vlgmr.msrb.gmra.mxu0 %v5101_v15  ;;  %1850 = vmatmul.bf16.vlgmr.msrb.gmra.mxu2 %v5101_v15  ;;  %v1370_v21 = vadd.f32 %v1369_v16, %v1352_v14 }
 0x1a7   : > { %v1400_v22 = vpop.f32.mrf.mxu0  ;;  %1899 = vmatpush.bf16.msra.mxu1 %v3609_v36  ;;  %v4185_v36 = vld [vmem:[#allocation14 + $0x8c] sm:$0xf0] }
 0x1a8   : > { %v1418_v47 = vpop.f32.mrf.mxu1  ;;  %v1388_v25 = vadd.f32 %v1387_v19, %v1370_v21  ;;  %v1401_v39 = vadd.f32 %v1400_v22, %v996_v34  ;;  %v3748_v19 = vld [vmem:[#allocation14 + $0xe0] sm:$0xf]  ;;  %v4195_v21 = vld [vmem:[#allocation14 + $0xe4] sm:$0xf] }
 0x1a9   : > { %v3749_v22 = vor.u32 %v4197_v20, %v3748_v19  ;;  %v3756_v20 = vld [vmem:[#allocation14 + $0xe8] sm:$0xf] }
 0x1aa   : > { %v1467_v33 = vmax.f32 %v1388_v25, 0.0  ;;  %v1419_v50 = vadd.f32 %v1418_v47, %v1401_v39  ;;  %v3750_v47 = vld [vmem:[#allocation14 + $0xf0] sm:$0xf0] }
 0x1ab   : > { %1900 = vmatpush.bf16.msra.mxu1 %v3601_v45  ;;  %v3753_v23 = vor.u32 %v4195_v21, %v3750_v47  ;;  %2318 = vmatpush.bf16.msra.mxu2 %v3749_v22  ;;  %v3702_v39 = vld [vmem:[#allocation14 + $0x90] sm:$0xf0]  ;;  %v3685_v45 = vor.u32 %v4181_v43, %v3684_v41  ;;  %v4198_v21 = vld [vmem:[#allocation14 + $0xf4] sm:$0xf0]  ;;  %v4196_v22 = vld [vmem:[#allocation14 + $0xec] sm:$0xf] }
 0x1ac   : > { %v1471_v38 = vpack.c.bf16 %v1467_v33, %v1467_v33  ;;  %v3721_v33 = vor.u32 %v4187_v30, %v3718_v32  ;;  %v3757_v47 = vor.u32 %v4198_v21, %v3756_v20  ;;  %v4194_v32 = vld [vmem:[#allocation14 + $0xd4] sm:$0xf0]  ;;  %v5122_v41 = vld [vmem:[%s5246_s6] ss:$0 sm:$0xff]  ;;  %v3694_v21 = vld [vmem:[#allocation14 + $0x78] sm:$0xf0] }
 0x1ad   : > { %v1371_v26 = vpop.f32.mrf.mxu2  ;;  %2354 = vmatpush.bf16.msrb.mxu0 %v3753_v23  ;;  %v3758_v23 = vld [vmem:[#allocation14 + $0xf8] sm:$0xf0] }
 0x1ae   : > { %v1389_v29 = vpop.f32.mrf.mxu3  ;;  %v3734_v26 = vld [vmem:[#allocation14 + $0xd0] sm:$0xf0] }
 0x1af   : > { %v1402_v35 = vpop.f32.mrf.mxu0  ;;  %1901 = vmatpush.bf16.msra.mxu1 %v3593_v12  ;;  %v3737_v27 = vor.u32 %v4191_v24, %v3734_v26  ;;  %v4189_v29 = vld [vmem:[#allocation14 + $0xac] sm:$0xf0]  ;;  %v3844_v24 = vld [vmem:[#allocation14 + $0x1a0] sm:$0xf]  ;;  %v4219_v26 = vld [vmem:[#allocation14 + $0x1a4] sm:$0xf] }
 0x1b0   : > { %v1420_v37 = vpop.f32.mrf.mxu1  ;;  %v1403_v51 = vadd.f32 %v1402_v35, %v996_v34  ;;  %v3717_v31 = vor.u32 %v4189_v29, %v3716_v28  ;;  %v3700_v35 = vld [vmem:[#allocation14 + $0x80] sm:$0xf]  ;;  %v4177_v12 = vld [vmem:[#allocation14 + $0x4c] sm:$0xf0]  ;;  %v3846_v28 = vld [vmem:[#allocation14 + $0x1b0] sm:$0xf0] }
 0x1b1   : > { %2355 = vmatpush.bf16.msrb.mxu0 %v3737_v27  ;;  %v3849_v30 = vor.u32 %v4219_v26, %v3846_v28  ;;  %v3782_v26 = vld [vmem:[#allocation14 + $0x130] sm:$0xf0] }
 0x1b2   : > { %v1421_v56 = vadd.f32 %v1420_v37, %v1403_v51  ;;  %v3701_v37 = vor.u32 %v4185_v36, %v3700_v35  ;;  %v3742_v36 = vld [vmem:[#allocation14 + $0xd8] sm:$0xf0] }
 0x1b3   : > { %1902 = vmatpush.bf16.msra.mxu1 %v3585_v57  ;;  %v4173_v57 = vld [vmem:[#allocation14 + $0x2c] sm:$0xf0] }
 0x1b5   : > { %v1436_v40 = vpop.f32.mrf.mxu2  ;;  %2356 = vmatpush.bf16.msrb.mxu0 %v3721_v33  ;;  %v4192_v33 = vld [vmem:[#allocation14 + $0xcc] sm:$0xf] }
 0x1b6   : > { %v1454_v44 = vpop.f32.mrf.mxu3  ;;  %1618 = vmatmul.bf16.gmra.mxu0 %v1471_v38  ;;  %1855 = vmatmul.bf16.gmra.mxu2 %v1471_v38  ;;  %v1437_v42 = vadd.f32 %v1436_v40, %v1419_v50 }
 0x1b7   : > { %v1405_v52 = vpop.f32.mrf.mxu0  ;;  %1903 = vmatpush.bf16.msra.mxu1 %v3577_v2 }
 0x1b8   : > { %v1423_v53 = vpop.f32.mrf.mxu1  ;;  %v1455_v61 = vadd.f32 %v1454_v44, %v1437_v42  ;;  %v1406_v5 = vadd.f32 %v1405_v52, %v996_v34  ;;  %v4179_v44 = vld [vmem:[#allocation14 + $0x64] sm:$0xf]  ;;  %v3668_v52 = vld [vmem:[#allocation14 + $0x40] sm:$0xf] }
 0x1b9   : > { %v3689_v50 = vor.u32 %v4179_v44, %v3686_v46  ;;  %v3669_v54 = vor.u32 %v4177_v12, %v3668_v52  ;;  %v3830_v44 = vld [vmem:[#allocation14 + $0x190] sm:$0xf0]  ;;  %v3724_v46 = vld [vmem:[#allocation14 + $0xa8] sm:$0xf]  ;;  %v4188_v52 = vld [vmem:[#allocation14 + $0xac] sm:$0xf] }
 0x1ba   : > { %v1464_v4 = vmax.f32 %v1455_v61, 0.0  ;;  %v1424_v9 = vadd.f32 %v1423_v53, %v1406_v5  ;;  %v4175_v53 = vld [vmem:[#allocation14 + $0x44] sm:$0xf] }
 0x1bb   : > { %v3673_v42 = vor.u32 %v4175_v53, %v3670_v55  ;;  %v3726_v53 = vld [vmem:[#allocation14 + $0xb8] sm:$0xf0] }
 0x1bc   : > { %v3729_v55 = vor.u32 %v4188_v52, %v3726_v53  ;;  %v3660_v52 = vld [vmem:[#allocation14 + $0x28] sm:$0xf]  ;;  %v4172_v53 = vld [vmem:[#allocation14 + $0x2c] sm:$0xf] }
 0x1bd   : > { %v1438_v58 = vpop.f32.mrf.mxu2 }
 0x1be   : > { %v1439_v62 = vadd.f32 %v1438_v58, %v1421_v56  ;;  %v1456_v63 = vpop.f32.mrf.mxu3  ;;  %v3652_v56 = vld [vmem:[#allocation14 + $0x20] sm:$0xf]  ;;  %v4171_v58 = vld [vmem:[#allocation14 + $0x24] sm:$0xf] }
 0x1bf   : > { %v1407_v1 = vpop.f32.mrf.mxu0  ;;  %v3653_v59 = vor.u32 %v4173_v57, %v3652_v56  ;;  %v4213_v56 = vld [vmem:[#allocation14 + $0x16c] sm:$0xf0]  ;;  %v4211_v57 = vld [vmem:[#allocation14 + $0x164] sm:$0xf] }
 0x1c0   : > { %v1457_v0 = vadd.f32 %v1456_v63, %v1439_v62  ;;  %v1425_v3 = vpop.f32.mrf.mxu1  ;;  %v3657_v62 = vor.u32 %v4171_v58, %v3654_v60  ;;  %v3876_v63 = vld [vmem:[#allocation14 + $0x1e0] sm:$0xf]  ;;  %v4227_v1 = vld [vmem:[#allocation14 + $0x1e4] sm:$0xf]  ;;  %v3814_v60 = vld [vmem:[#allocation14 + $0x170] sm:$0xf0] }
 0x1c1   : > { %v3878_v3 = vld [vmem:[#allocation14 + $0x1f0] sm:$0xf0] }
 0x1c2   : > { %v1466_v6 = vmax.f32 %v1457_v0, 0.0  ;;  %v4229_v0 = vld [vmem:[#allocation14 + $0x1ec] sm:$0xf0]  ;;  %v3881_v5 = vor.u32 %v4227_v1, %v3878_v3  ;;  %v4186_v1 = vld [vmem:[#allocation14 + $0x94] sm:$0xf0] }
 0x1c3   : > { %v3877_v2 = vor.u32 %v4229_v0, %v3876_v63  ;;  %v3817_v63 = vor.u32 %v4211_v57, %v3814_v60  ;;  %v3708_v0 = vld [vmem:[#allocation14 + $0x88] sm:$0xf]  ;;  %v4228_v60 = vld [vmem:[#allocation14 + $0x1ec] sm:$0xf] }
 0x1c4   : > { %v1470_v7 = vpack.c.bf16 %v1466_v6, %v1464_v4  ;;  %v3636_v6 = vld [vmem:[#allocation14] sm:$0xf] }
 0x1c5   : > { %v1441_v8 = vpop.f32.mrf.mxu2  ;;  %2336 = vmatpush.bf16.msra.mxu3 %v3877_v2  ;;  %v4184_v2 = vld [vmem:[#allocation14 + $0x8c] sm:$0xf] }
 0x1c6   : > { %v1459_v10 = vpop.f32.mrf.mxu3  ;;  %1631 = vmatmul.bf16.vlgmr.msrb.gmra.mxu1 %v1470_v7  ;;  %1868 = vmatmul.bf16.vlgmr.msrb.gmra.mxu3 %v1470_v7  ;;  %v1442_v11 = vadd.f32 %v1441_v8, %v1424_v9  ;;  %v4167_v8 = vld [vmem:[#allocation14 + $0x4] sm:$0xf] }
 0x1c7   : > { %1886 = vmatmul.bf16.vlgmr.msra.gmra.mxu0 %v5101_v15  ;;  %v3732_v15 = vld [vmem:[#allocation14 + $0xc0] sm:$0xf]  ;;  %2372 = vmatpush.bf16.msrb.mxu1 %v3881_v5 }
 0x1c8   : > { %v1460_v13 = vadd.f32 %v1459_v10, %v1442_v11  ;;  %v3733_v25 = vor.u32 %v4193_v48, %v3732_v15  ;;  %v3638_v10 = vld [vmem:[#allocation14 + $0x10] sm:$0xf0]  ;;  %v3761_v48 = vor.u32 %v4196_v22, %v3758_v23  ;;  %v3780_v22 = vld [vmem:[#allocation14 + $0x120] sm:$0xf] }
 0x1c9   : > { %v3641_v11 = vor.u32 %v4167_v8, %v3638_v10  ;;  %v4207_v10 = vld [vmem:[#allocation14 + $0x144] sm:$0xf] }
 0x1ca   : > { %v1468_v17 = vmax.f32 %v1460_v13, 0.0  ;;  %2319 = vmatpush.bf16.msra.mxu2 %v3733_v25  ;;  %v3860_v13 = vld [vmem:[#allocation14 + $0x1c0] sm:$0xf]  ;;  %v4221_v25 = vld [vmem:[#allocation14 + $0x1ac] sm:$0xf0] }
 0x1cb   : > { %v3845_v27 = vor.u32 %v4221_v25, %v3844_v24  ;;  %v4203_v25 = vld [vmem:[#allocation14 + $0x124] sm:$0xf] }
 0x1cc   : > { %v1472_v18 = vpack.c.bf16 %v1468_v17, %v1468_v17 }
 0x1cd   : > { %v1443_v14 = vpop.f32.mrf.mxu2 }
 0x1ce   : > { %v1461_v16 = vpop.f32.mrf.mxu3  ;;  %2320 = vmatpush.bf16.msra.mxu2 %v3717_v31  ;;  %v4225_v14 = vld [vmem:[#allocation14 + $0x1cc] sm:$0xf0]  ;;  %v3740_v31 = vld [vmem:[#allocation14 + $0xc8] sm:$0xf] }
 0x1cf   : > { %v4223_v16 = vld [vmem:[#allocation14 + $0x1c4] sm:$0xf]  ;;  %v3861_v17 = vor.u32 %v4225_v14, %v3860_v13  ;;  %v3741_v35 = vor.u32 %v4194_v32, %v3740_v31  ;;  %v3798_v14 = vld [vmem:[#allocation14 + $0x150] sm:$0xf0]  ;;  %v3676_v31 = vld [vmem:[#allocation14 + $0x48] sm:$0xf] }
 0x1d0   : > { %v4178_v32 = vld [vmem:[#allocation14 + $0x54] sm:$0xf0] }
 0x1d1   : > { %2337 = vmatpush.bf16.msra.mxu3 %v3861_v17  ;;  %v3692_v17 = vld [vmem:[#allocation14 + $0x68] sm:$0xf] }
 0x1d2   : > { %2321 = vmatpush.bf16.msra.mxu2 %v3701_v37  ;;  %v3745_v37 = vor.u32 %v4192_v33, %v3742_v36  ;;  %v4176_v33 = vld [vmem:[#allocation14 + $0x4c] sm:$0xf] }
 0x1d5   : > { %2338 = vmatpush.bf16.msra.mxu3 %v3845_v27 }
 0x1d6   : > { %1636 = vmatmul.bf16.gmra.mxu1 %v1472_v18  ;;  %1873 = vmatmul.bf16.gmra.mxu3 %v1472_v18 }
 0x1d7   : > { %1891 = vmatmul.bf16.gmra.mxu0 %v1471_v38  ;;  %v4183_v38 = vld [vmem:[#allocation14 + $0x84] sm:$0xf]  ;;  %2322 = vmatpush.bf16.msra.mxu2 %v3685_v45 }
 0x1d8   : > { %v3705_v40 = vor.u32 %v4183_v38, %v3702_v39  ;;  %v3828_v38 = vld [vmem:[#allocation14 + $0x180] sm:$0xf]  ;;  %v4217_v39 = vld [vmem:[#allocation14 + $0x18c] sm:$0xf0] }
 0x1d9   : > { %v3829_v43 = vor.u32 %v4217_v39, %v3828_v38  ;;  %v3678_v38 = vld [vmem:[#allocation14 + $0x58] sm:$0xf0] }
 0x1da   : > { %2357 = vmatpush.bf16.msrb.mxu0 %v3705_v40  ;;  %v4215_v40 = vld [vmem:[#allocation14 + $0x184] sm:$0xf]  ;;  %v3681_v39 = vor.u32 %v4176_v33, %v3678_v38 }
 0x1db   : > { %2323 = vmatpush.bf16.msra.mxu2 %v3669_v54  ;;  %v3833_v45 = vor.u32 %v4215_v40, %v3830_v44  ;;  %2339 = vmatpush.bf16.msra.mxu3 %v3829_v43  ;;  %v3764_v40 = vld [vmem:[#allocation14 + $0x100] sm:$0xf]  ;;  %v4201_v43 = vld [vmem:[#allocation14 + $0x10c] sm:$0xf0]  ;;  %v4199_v44 = vld [vmem:[#allocation14 + $0x104] sm:$0xf] }
 0x1de   : > { %2358 = vmatpush.bf16.msrb.mxu0 %v3689_v50  ;;  %v4190_v50 = vld [vmem:[#allocation14 + $0xb4] sm:$0xf0] }
 0x1df   : > { %2324 = vmatpush.bf16.msra.mxu2 %v3653_v59  ;;  %v3725_v12 = vor.u32 %v4190_v50, %v3724_v46  ;;  %v3766_v46 = vld [vmem:[#allocation14 + $0x110] sm:$0xf0] }
 0x1e0   : > { %v3769_v50 = vor.u32 %v4199_v44, %v3766_v46  ;;  %v3820_v44 = vld [vmem:[#allocation14 + $0x168] sm:$0xf] }
 0x1e1   : > { %v3804_v46 = vld [vmem:[#allocation14 + $0x148] sm:$0xf] }
 0x1e2   : > { %2359 = vmatpush.bf16.msrb.mxu0 %v3673_v42  ;;  %v3812_v42 = vld [vmem:[#allocation14 + $0x160] sm:$0xf] }
 0x1e3   : > { %v3813_v59 = vor.u32 %v4213_v56, %v3812_v42  ;;  %v3662_v56 = vld [vmem:[#allocation14 + $0x38] sm:$0xf0] }
 0x1e5   : > { %2340 = vmatpush.bf16.msra.mxu3 %v3813_v59  ;;  %v4230_v59 = vld [vmem:[#allocation14 + $0x1f4] sm:$0xf0] }
 0x1e6   : > { %1904 = vmatmul.bf16.vlgmr.msra.gmra.mxu1 %v1470_v7  ;;  %2360 = vmatpush.bf16.msrb.mxu0 %v3657_v62  ;;  %v4169_v7 = vld [vmem:[#allocation14 + $0xc] sm:$0xf0] }
 0x1e7   : > { %v3637_v9 = vor.u32 %v4169_v7, %v3636_v6  ;;  %v3709_v6 = vor.u32 %v4186_v1, %v3708_v0  ;;  %v3710_v7 = vld [vmem:[#allocation14 + $0x98] sm:$0xf0] }
 0x1e8   : > { %v3713_v8 = vor.u32 %v4184_v2, %v3710_v7  ;;  %v3886_v1 = vld [vmem:[#allocation14 + $0x1f8] sm:$0xf0]  ;;  %v4168_v7 = vld [vmem:[#allocation14 + $0xc] sm:$0xf] }
 0x1e9   : > { %2325 = vmatpush.bf16.msra.mxu2 %v3637_v9  ;;  %v3796_v9 = vld [vmem:[#allocation14 + $0x140] sm:$0xf] }
 0x1ea   : > { %2361 = vmatpush.bf16.msrb.mxu0 %v3641_v11  ;;  %v5128_v11 = vld [vmem:[#allocation13] sm:$0x3] }
 0x1eb   : > { %v5135_v27 = vperm.slane %v5128_v11, 0 }
 0x1ed   : > { %2390 = vmatpush.bf16.msrb.mxu2 %v3757_v47  ;;  %v4205_v47 = vld [vmem:[#allocation14 + $0x12c] sm:$0xf0] }
 0x1ee   : > { %2426 = vmatpush.bf16.msra.mxu0 %v3761_v48  ;;  %v3781_v24 = vor.u32 %v4205_v47, %v3780_v22  ;;  %v3852_v22 = vld [vmem:[#allocation14 + $0x1a8] sm:$0xf]  ;;  %v4222_v47 = vld [vmem:[#allocation14 + $0x1b4] sm:$0xf0] }
 0x1f1   : > { %2391 = vmatpush.bf16.msrb.mxu2 %v3741_v35 }
 0x1f2   : > { %2427 = vmatpush.bf16.msra.mxu0 %v3745_v37  ;;  %v3677_v37 = vor.u32 %v4178_v32, %v3676_v31  ;;  %v4218_v31 = vld [vmem:[#allocation14 + $0x194] sm:$0xf0]  ;;  %v4216_v32 = vld [vmem:[#allocation14 + $0x18c] sm:$0xf] }
 0x1f5   : > { %2392 = vmatpush.bf16.msrb.mxu2 %v3725_v12  ;;  %v4174_v12 = vld [vmem:[#allocation14 + $0x34] sm:$0xf0] }
 0x1f6   : > { %1909 = vmatmul.bf16.gmra.mxu1 %v1472_v18  ;;  %v3862_v18 = vld [vmem:[#allocation14 + $0x1d0] sm:$0xf0]  ;;  %2428 = vmatpush.bf16.msra.mxu0 %v3729_v55  ;;  %v3661_v42 = vor.u32 %v4174_v12, %v3660_v52 }
 0x1f7   : > { %v3865_v19 = vor.u32 %v4223_v16, %v3862_v18  ;;  %v3801_v16 = vor.u32 %v4207_v10, %v3798_v14  ;;  %v4182_v18 = vld [vmem:[#allocation14 + $0x74] sm:$0xf0]  ;;  %v3646_v14 = vld [vmem:[#allocation14 + $0x18] sm:$0xf0] }
 0x1f8   : > { %v3693_v20 = vor.u32 %v4182_v18, %v3692_v17  ;;  %v4224_v17 = vld [vmem:[#allocation14 + $0x1cc] sm:$0xf] }
 0x1f9   : > { %2373 = vmatpush.bf16.msrb.mxu1 %v3865_v19  ;;  %2393 = vmatpush.bf16.msrb.mxu2 %v3709_v6  ;;  %v4180_v19 = vld [vmem:[#allocation14 + $0x6c] sm:$0xf]  ;;  %v4170_v6 = vld [vmem:[#allocation14 + $0x14] sm:$0xf0] }
 0x1fa   : > { %2429 = vmatpush.bf16.msra.mxu0 %v3713_v8  ;;  %v3697_v48 = vor.u32 %v4180_v19, %v3694_v21 }
 0x1fd   : > { %2374 = vmatpush.bf16.msrb.mxu1 %v3849_v30  ;;  %2394 = vmatpush.bf16.msrb.mxu2 %v3693_v20  ;;  %v3870_v20 = vld [vmem:[#allocation14 + $0x1d8] sm:$0xf0] }
 0x1fe   : > { %2430 = vmatpush.bf16.msra.mxu0 %v3697_v48  ;;  %v3873_v21 = vor.u32 %v4224_v17, %v3870_v20  ;;  %v3853_v48 = vor.u32 %v4222_v47, %v3852_v22  ;;  %v4246_v20 = vld [vmem:[#allocation16 + $0x78] sm:$0xff]  ;;  %v4244_v22 = vld [vmem:[#allocation16 + $0x68] sm:$0xff]  ;;  %v4237_v47 = vld [vmem:[#allocation16 + $0x30] sm:$0xff] }
 0x201   : > { %2375 = vmatpush.bf16.msrb.mxu1 %v3833_v45  ;;  %2395 = vmatpush.bf16.msrb.mxu2 %v3677_v37  ;;  %v3765_v45 = vor.u32 %v4201_v43, %v3764_v40  ;;  %v3838_v37 = vld [vmem:[#allocation14 + $0x198] sm:$0xf0] }
 0x202   : > { %2431 = vmatpush.bf16.msra.mxu0 %v3681_v39  ;;  %v3841_v39 = vor.u32 %v4216_v32, %v3838_v37  ;;  %v4262_v37 = vld [vmem:[#allocation16 + $0xf8] sm:$0xff] }
 0x205   : > { %2376 = vmatpush.bf16.msrb.mxu1 %v3817_v63  ;;  %2396 = vmatpush.bf16.msrb.mxu2 %v3661_v42 }
 0x209   : > { %2377 = vmatpush.bf16.msrb.mxu1 %v3801_v16  ;;  %v4226_v16 = vld [vmem:[#allocation14 + $0x1d4] sm:$0xf0] }
 0x223   : > { %v5107_v34 = vpop.f32.mrf.mxu0 }
 0x224   : > { %v1615_v58 = vadd.f32 %v5122_v41, %v5107_v34  ;;  %v4209_v34 = vld [vmem:[#allocation14 + $0x14c] sm:$0xf0] }
 0x225   : > { %v3797_v13 = vor.u32 %v4209_v34, %v3796_v9 }
 0x227   : > { %2341 = vmatpush.bf16.msra.mxu3 %v3797_v13 }
 0x229   : > { %v5109_v49 = vpop.f32.mrf.mxu2 }
 0x22b   : > { %v5111_v51 = vpop.f32.mrf.mxu0  ;;  %2342 = vmatpush.bf16.msra.mxu3 %v3781_v24  ;;  %v4220_v24 = vld [vmem:[#allocation14 + $0x1ac] sm:$0xf] }
 0x22c   : > { %v1617_v28 = vadd.f32 %v5122_v41, %v5111_v51  ;;  %v1852_v51 = vadd.f32 %v5109_v49, %v5135_v27  ;;  %v3884_v49 = vld [vmem:[#allocation14 + $0x1e8] sm:$0xf] }
 0x22d   : > { %v3885_v0 = vor.u32 %v4230_v59, %v3884_v49  ;;  %v3788_v49 = vld [vmem:[#allocation14 + $0x128] sm:$0xf]  ;;  %v4206_v59 = vld [vmem:[#allocation14 + $0x134] sm:$0xf0] }
 0x22f   : > { %2343 = vmatpush.bf16.msra.mxu3 %v3765_v45  ;;  %v4212_v45 = vld [vmem:[#allocation14 + $0x16c] sm:$0xf] }
 0x231   : > { %v5113_v61 = vpop.f32.mrf.mxu2 }
 0x233   : > { %v5115_v4 = vpop.f32.mrf.mxu0  ;;  %2408 = vmatpush.bf16.msrb.mxu3 %v3885_v0  ;;  %v3772_v0 = vld [vmem:[#allocation14 + $0x108] sm:$0xf] }
 0x239   : > { %v5117_v15 = vpop.f32.mrf.mxu2 }
 0x23b   : > { %v1621_v29 = vpop.f32.mrf.mxu0 }
 0x23c   : > { %v3785_v29 = vor.u32 %v4203_v25, %v3782_v26  ;;  %v3854_v25 = vld [vmem:[#allocation14 + $0x1b8] sm:$0xf0]  ;;  %v1857_v26 = vadd.f32 %v5117_v15, %v5135_v27 }
 0x23e   : > { %2378 = vmatpush.bf16.msrb.mxu1 %v3785_v29 }
 0x241   : > { %v1858_v54 = vpop.f32.mrf.mxu2 }
 0x242   : > { %v1854_v54 = vadd.f32 %v5113_v61, %v5135_v27  ;;  %2379 = vmatpush.bf16.msrb.mxu1 %v3769_v50  ;;  %v3889_v61 = vor.u32 %v4228_v60, %v3886_v1  ;;  %v3822_v27 = vld [vmem:[#allocation14 + $0x178] sm:$0xf0]  ;;  %v4210_v50 = vld [vmem:[#allocation14 + $0x154] sm:$0xf0]  ;;  %v4204_v60 = vld [vmem:[#allocation14 + $0x12c] sm:$0xf] }
 0x243   : > { %v1632_v62 = vpop.f32.mrf.mxu1  ;;  %v3825_v12 = vor.u32 %v4212_v45, %v3822_v27  ;;  %v3805_v42 = vor.u32 %v4210_v50, %v3804_v46  ;;  %v4253_v45 = vld [vmem:[#allocation16 + $0xb0] sm:$0xff]  ;;  %v4252_v46 = vld [vmem:[#allocation16 + $0xa8] sm:$0xff] }
 0x244   : > { %v1633_v3 = vadd.f32 %v1632_v62, %v1615_v58  ;;  %v5126_v5 = vpop.f32.mrf.mxu0  ;;  %v3665_v58 = vor.u32 %v4172_v53, %v3662_v56  ;;  %v1620_v62 = vadd.f32 %v5122_v41, %v5115_v4  ;;  %v3649_v4 = vor.u32 %v4168_v7, %v3646_v14  ;;  %v3868_v41 = vld [vmem:[#allocation14 + $0x1c8] sm:$0xf]  ;;  %v4208_v53 = vld [vmem:[#allocation14 + $0x14c] sm:$0xf] }
 0x245   : > { %v3869_v19 = vor.u32 %v4226_v16, %v3868_v41  ;;  %v5170_v50 = vld [vmem:[%s5283_s18] sm:$0xf] }
 0x246   : > { %1641 = vst [vmem:[%s5131_s13] sm:$0xff] %v1633_v3  ;;  %2432 = vmatpush.bf16.msra.mxu0 %v3665_v58  ;;  %v3644_v3 = vld [vmem:[#allocation14 + $0x8] sm:$0xf]  ;;  %2444 = vmatpush.bf16.msra.mxu1 %v3889_v61  ;;  %v4202_v61 = vld [vmem:[#allocation14 + $0x114] sm:$0xf0] }
 0x247   : > { %v3645_v13 = vor.u32 %v4170_v6, %v3644_v3  ;;  %2409 = vmatpush.bf16.msrb.mxu3 %v3869_v19  ;;  %v4200_v3 = vld [vmem:[#allocation14 + $0x10c] sm:$0xf]  ;;  %v3774_v6 = vld [vmem:[#allocation14 + $0x118] sm:$0xf0] }
 0x249   : > { %v1869_v23 = vpop.f32.mrf.mxu3  ;;  %2397 = vmatpush.bf16.msrb.mxu2 %v3645_v13 }
 0x24a   : > { %v1870_v55 = vadd.f32 %v1869_v23, %v1852_v51  ;;  %2433 = vmatpush.bf16.msra.mxu0 %v3649_v4  ;;  %2445 = vmatpush.bf16.msra.mxu1 %v3873_v21  ;;  %v4214_v51 = vld [vmem:[#allocation14 + $0x174] sm:$0xf0]  ;;  %v4245_v21 = vld [vmem:[#allocation16 + $0x70] sm:$0xff] }
 0x24b   : > { %v1634_v30 = vpop.f32.mrf.mxu1  ;;  %2410 = vmatpush.bf16.msrb.mxu3 %v3853_v48  ;;  %v3821_v15 = vor.u32 %v4214_v51, %v3820_v44  ;;  %v4242_v48 = vld [vmem:[#allocation16 + $0x58] sm:$0xff]  ;;  %v4260_v51 = vld [vmem:[#allocation16 + $0xe8] sm:$0xff] }
 0x24c   : > { %v1635_v35 = vadd.f32 %v1634_v30, %v1617_v28  ;;  %v5139_v36 = vpop.f32.mrf.mxu0  ;;  %v1914_v8 = vmax.f32 %v1870_v55, 0.0  ;;  %v3857_v28 = vor.u32 %v4220_v24, %v3854_v25  ;;  %v3836_v30 = vld [vmem:[#allocation14 + $0x188] sm:$0xf]  ;;  %v1679_v55 = vperm.slane %v5128_v11, 1  ;;  %v4235_v24 = vld [vmem:[#allocation16 + $0x20] sm:$0xff]  ;;  %v4241_v25 = vld [vmem:[#allocation16 + $0x50] sm:$0xff] }
 0x24d   : > { %v3837_v38 = vor.u32 %v4218_v31, %v3836_v30  ;;  %v4233_v30 = vld [vmem:[#allocation16 + $0x10] sm:$0xff]  ;;  %v4239_v31 = vld [vmem:[#allocation16 + $0x40] sm:$0xff] }
 0x24e   : > { %1642 = vst [vmem:[%s5131_s13 + $0x8] sm:$0xff] %v1635_v35  ;;  %2446 = vmatpush.bf16.msra.mxu1 %v3857_v28  ;;  %v1888_v58 = vadd.f32 %v5126_v5, %v1679_v55  ;;  %v1890_v1 = vadd.f32 %v5139_v36, %v1679_v55  ;;  %v3773_v5 = vor.u32 %v4202_v61, %v3772_v0  ;;  %v4256_v0 = vld [vmem:[#allocation16 + $0xc8] sm:$0xff] }
 0x24f   : > { %2411 = vmatpush.bf16.msrb.mxu3 %v3837_v38  ;;  %v4231_v38 = vld [vmem:[#allocation16] sm:$0xff] }
 0x251   : > { %v1871_v57 = vpop.f32.mrf.mxu3 }
 0x252   : > { %v1872_v63 = vadd.f32 %v1871_v57, %v1854_v54  ;;  %2447 = vmatpush.bf16.msra.mxu1 %v3841_v39  ;;  %v3806_v54 = vld [vmem:[#allocation14 + $0x158] sm:$0xf0]  ;;  %v4261_v39 = vld [vmem:[#allocation16 + $0xf0] sm:$0xff] }
 0x253   : > { %v1637_v2 = vpop.f32.mrf.mxu1  ;;  %2412 = vmatpush.bf16.msrb.mxu3 %v3821_v15  ;;  %v3809_v56 = vor.u32 %v4208_v53, %v3806_v54  ;;  %v4259_v15 = vld [vmem:[#allocation16 + $0xe0] sm:$0xff]  ;;  %v1991_v54 = vperm.slane %v5170_v50, 1 }
 0x254   : > { %v1916_v9 = vmax.f32 %v1872_v63, 0.0  ;;  %v1638_v34 = vadd.f32 %v1637_v2, %v1620_v62  ;;  %v5148_v10 = vpop.f32.mrf.mxu0  ;;  %v3789_v62 = vor.u32 %v4206_v59, %v3788_v49  ;;  %v3790_v63 = vld [vmem:[#allocation14 + $0x138] sm:$0xf0] }
 0x255   : > { %v3793_v2 = vor.u32 %v4204_v60, %v3790_v63  ;;  %v1893_v36 = vadd.f32 %v5148_v10, %v1679_v55  ;;  %v4238_v10 = vld [vmem:[#allocation16 + $0x38] sm:$0xff]  ;;  %v4251_v55 = vld [vmem:[#allocation16 + $0xa0] sm:$0xff]  ;;  %v1990_v60 = vperm.slane %v5170_v50, 0 }
 0x256   : > { %v5150_v18 = vpack.c.bf16 %v1916_v9, %v1914_v8  ;;  %1643 = vst [vmem:[%s5131_s13 + $0x10] sm:$0xff] %v1638_v34  ;;  %2448 = vmatpush.bf16.msra.mxu1 %v3825_v12  ;;  %v3777_v9 = vor.u32 %v4200_v3, %v3774_v6  ;;  %v4258_v12 = vld [vmem:[#allocation16 + $0xd8] sm:$0xff]  ;;  %s4715_s13 = scalar_lea.hbm %s5284_s9, 48 }
 0x257   : > { %2413 = vmatpush.bf16.msrb.mxu3 %v3805_v42  ;;  %v4257_v42 = vld [vmem:[#allocation16 + $0xd0] sm:$0xff]  ;;  %p4717_p7 = scmp.lt.s32.totalorder %s4715_s13, %s4711_s17 }
 0x258   : > { %2326 = vmatmul.bf16.vlgmr.msra.gmra.mxu2 %v5150_v18  ;;  %2362 = vmatmul.bf16.vlgmr.msrb.gmra.mxu0 %v5150_v18 }
 0x259   : > { %v1874_v23 = vpop.f32.mrf.mxu3  ;;  %2742 = vmatpush.bf16.msra.mxu2 %v4238_v10  ;;  %p4718_p8 = por %p4717_p7, %p4716_p12 }
 0x25a   : > { %v1875_v33 = vadd.f32 %v1874_v23, %v1857_v26  ;;  %2449 = vmatpush.bf16.msra.mxu1 %v3809_v56  ;;  %v4236_v23 = vld [vmem:[#allocation16 + $0x28] sm:$0xff]  ;;  %v4234_v26 = vld [vmem:[#allocation16 + $0x18] sm:$0xff] }
 0x25b   : > { %v1639_v29 = vpop.f32.mrf.mxu1  ;;  %2414 = vmatpush.bf16.msrb.mxu3 %v3789_v62  ;;  %p4719_p9 = pnand %p4718_p8, %p4714_p5 }
 0x25c   : > { %v1894_v35 = vpop.f32.mrf.mxu0  ;;  %v1918_v40 = vmax.f32 %v1875_v33, 0.0  ;;  %v4240_v29 = vld [vmem:[#allocation16 + $0x48] sm:$0xff] }
 0x25d   : > { %2743 = vmatpush.bf16.msra.mxu2 %v4237_v47  ;;  %v4232_v33 = vld [vmem:[#allocation16 + $0x8] sm:$0xff] }
 0x25e   : > { %v1922_v57 = vpack.c.bf16 %v1918_v40, %v1918_v40  ;;  %2450 = vmatpush.bf16.msra.mxu1 %v3793_v2  ;;  %v4249_v2 = vld [vmem:[#allocation16 + $0x90] sm:$0xff] }
 0x25f   : > { %2415 = vmatpush.bf16.msrb.mxu3 %v3773_v5 }
 0x261   : > { %v1876_v43 = vpop.f32.mrf.mxu3  ;;  %2744 = vmatpush.bf16.msra.mxu2 %v4236_v23 }
 0x262   : > { %2451 = vmatpush.bf16.msra.mxu1 %v3777_v9  ;;  %v4254_v43 = vld [vmem:[#allocation16 + $0xb8] sm:$0xff] }
 0x263   : > { %v1905_v52 = vpop.f32.mrf.mxu1  ;;  %2778 = vmatpush.bf16.msrb.mxu0 %v4254_v43 }
 0x264   : > { %v1906_v11 = vadd.f32 %v1905_v52, %v1888_v58  ;;  %v4250_v58 = vld [vmem:[#allocation16 + $0x98] sm:$0xff] }
 0x265   : > { %2745 = vmatpush.bf16.msra.mxu2 %v4235_v24 }
 0x266   : > { %v1915_v34 = vmax.f32 %v1906_v11, 0.0 }
 0x267   : > { %2779 = vmatpush.bf16.msrb.mxu0 %v4253_v45 }
 0x268   : > { %2331 = vmatmul.bf16.gmra.mxu2 %v1922_v57  ;;  %2367 = vmatmul.bf16.gmra.mxu0 %v1922_v57 }
 0x269   : > { %2746 = vmatpush.bf16.msra.mxu2 %v4234_v26 }
 0x26b   : > { %v1907_v7 = vpop.f32.mrf.mxu1  ;;  %2780 = vmatpush.bf16.msrb.mxu0 %v4252_v46 }
 0x26c   : > { %v1908_v8 = vadd.f32 %v1907_v7, %v1890_v1  ;;  %v4255_v7 = vld [vmem:[#allocation16 + $0xc0] sm:$0xff] }
 0x26d   : > { %2747 = vmatpush.bf16.msra.mxu2 %v4233_v30 }
 0x26e   : > { %v1917_v13 = vmax.f32 %v1908_v8, 0.0 }
 0x26f   : > { %2781 = vmatpush.bf16.msrb.mxu0 %v4251_v55 }
 0x270   : > { %v1921_v14 = vpack.c.bf16 %v1917_v13, %v1915_v34  ;;  %v4248_v13 = vld [vmem:[#allocation16 + $0x88] sm:$0xff] }
 0x271   : > { %2748 = vmatpush.bf16.msra.mxu2 %v4232_v33  ;;  %v1993_v33 = vperm.slane %v5170_v50, 3 }
 0x272   : > { %2344 = vmatmul.bf16.vlgmr.msra.gmra.mxu3 %v1921_v14  ;;  %2380 = vmatmul.bf16.vlgmr.msrb.gmra.mxu1 %v1921_v14 }
 0x273   : > { %v1910_v4 = vpop.f32.mrf.mxu1  ;;  %2760 = vmatpush.bf16.msra.mxu3 %v4246_v20  ;;  %2796 = vmatpush.bf16.msrb.mxu1 %v4262_v37 }
 0x274   : > { %v1911_v41 = vadd.f32 %v1910_v4, %v1893_v36  ;;  %2782 = vmatpush.bf16.msrb.mxu0 %v4250_v58 }
 0x275   : > { %2749 = vmatpush.bf16.msra.mxu2 %v4231_v38 }
 0x276   : > { %v1919_v17 = vmax.f32 %v1911_v41, 0.0 }
 0x277   : > { %2761 = vmatpush.bf16.msra.mxu3 %v4245_v21  ;;  %2797 = vmatpush.bf16.msrb.mxu1 %v4261_v39 }
 0x278   : > { %2398 = vmatmul.bf16.vlgmr.msrb.gmra.mxu2 %v5150_v18  ;;  %2434 = vmatmul.bf16.vlgmr.msra.gmra.mxu0 %v5150_v18  ;;  %v1923_v19 = vpack.c.bf16 %v1919_v17, %v1919_v17  ;;  %v4243_v18 = vld [vmem:[#allocation16 + $0x60] sm:$0xff] }
 0x279   : > { %4265 = vmatpush.bf16.msrb.mxu2 %v4254_v43  ;;  %2783 = vmatpush.bf16.msrb.mxu0 %v4249_v2 }
 0x27b   : > { %v1912_v16 = vpop.f32.mrf.mxu1  ;;  %2762 = vmatpush.bf16.msra.mxu3 %v4244_v22  ;;  %2798 = vmatpush.bf16.msrb.mxu1 %v4260_v51 }
 0x27d   : > { %4266 = vmatpush.bf16.msrb.mxu2 %v4253_v45  ;;  %2784 = vmatpush.bf16.msrb.mxu0 %v4248_v13 }
 0x27f   : > { %2763 = vmatpush.bf16.msra.mxu3 %v4243_v18  ;;  %2799 = vmatpush.bf16.msrb.mxu1 %v4259_v15 }
 0x281   : > { %4267 = vmatpush.bf16.msrb.mxu2 %v4252_v46 }
 0x282   : > { %2349 = vmatmul.bf16.gmra.mxu3 %v1923_v19  ;;  %2385 = vmatmul.bf16.gmra.mxu1 %v1923_v19 }
 0x283   : > { %2764 = vmatpush.bf16.msra.mxu3 %v4242_v48  ;;  %2800 = vmatpush.bf16.msrb.mxu1 %v4258_v12 }
 0x285   : > { %4268 = vmatpush.bf16.msrb.mxu2 %v4251_v55 }
 0x287   : > { %2765 = vmatpush.bf16.msra.mxu3 %v4241_v25  ;;  %2801 = vmatpush.bf16.msrb.mxu1 %v4257_v42 }
 0x288   : > { %2403 = vmatmul.bf16.gmra.mxu2 %v1922_v57  ;;  %2439 = vmatmul.bf16.gmra.mxu0 %v1922_v57 }
 0x289   : > { %4269 = vmatpush.bf16.msrb.mxu2 %v4250_v58 }
 0x28b   : > { %2766 = vmatpush.bf16.msra.mxu3 %v4240_v29  ;;  %2802 = vmatpush.bf16.msrb.mxu1 %v4256_v0 }
 0x28d   : > { %4270 = vmatpush.bf16.msrb.mxu2 %v4249_v2 }
 0x28f   : > { %2767 = vmatpush.bf16.msra.mxu3 %v4239_v31  ;;  %2803 = vmatpush.bf16.msrb.mxu1 %v4255_v7 }
 0x291   : > { %4271 = vmatpush.bf16.msrb.mxu2 %v4248_v13 }
 0x292   : > { %2416 = vmatmul.bf16.vlgmr.msrb.gmra.mxu3 %v1921_v14  ;;  %2452 = vmatmul.bf16.vlgmr.msra.gmra.mxu1 %v1921_v14 }
 0x293   : > { %4273 = vmatpush.bf16.msrb.mxu3 %v4262_v37 }
 0x297   : > { %4274 = vmatpush.bf16.msrb.mxu3 %v4261_v39 }
 0x29b   : > { %4275 = vmatpush.bf16.msrb.mxu3 %v4260_v51 }
 0x29f   : > { %4276 = vmatpush.bf16.msrb.mxu3 %v4259_v15 }
 0x2a2   : > { %2421 = vmatmul.bf16.gmra.mxu3 %v1923_v19  ;;  %2457 = vmatmul.bf16.gmra.mxu1 %v1923_v19  ;;  %v4247_v19 = vld [vmem:[#allocation16 + $0x80] sm:$0xff] }
 0x2a3   : > { %4277 = vmatpush.bf16.msrb.mxu3 %v4258_v12  ;;  %2785 = vmatpush.bf16.msrb.mxu0 %v4247_v19 }
 0x2a4   : > { %4272 = vmatpush.bf16.msrb.mxu2 %v4247_v19 }
 0x2a7   : > { %4278 = vmatpush.bf16.msrb.mxu3 %v4257_v42 }
 0x2ab   : > { %4279 = vmatpush.bf16.msrb.mxu3 %v4256_v0 }
 0x2af   : > { %4280 = vmatpush.bf16.msrb.mxu3 %v4255_v7 }
 0x2d5   : > { %v2363_v28 = vpop.f32.mrf.mxu0 }
 0x2d6   : > { %v2364_v57 = vadd.f32 %v2363_v28, %v1991_v54 }
 0x2db   : > { %v2327_v32 = vpop.f32.mrf.mxu2 }
 0x2dc   : > { %v2328_v61 = vadd.f32 %v2327_v32, %v1990_v60 }
 0x2dd   : > { %v2365_v35 = vpop.f32.mrf.mxu0 }
 0x2de   : > { %v2366_v62 = vadd.f32 %v2365_v35, %v1991_v54 }
 0x2e3   : > { %v2329_v40 = vpop.f32.mrf.mxu2 }
 0x2e4   : > { %v2330_v5 = vadd.f32 %v2329_v40, %v1990_v60  ;;  %v1992_v40 = vperm.slane %v5170_v50, 2 }
 0x2e5   : > { %v5163_v44 = vpop.f32.mrf.mxu0 }
 0x2e6   : > { %v2369_v20 = vadd.f32 %v5163_v44, %v1991_v54 }
 0x2eb   : > { %v5165_v27 = vpop.f32.mrf.mxu2 }
 0x2ec   : > { %v2333_v48 = vadd.f32 %v5165_v27, %v1990_v60 }
 0x2ed   : > { %v2370_v52 = vpop.f32.mrf.mxu0 }
 0x2ef   : > { %v2381_v53 = vpop.f32.mrf.mxu1 }
 0x2f0   : > { %v2382_v63 = vadd.f32 %v2381_v53, %v2364_v57 }
 0x2f2   : > { %v2463_v3 = vmax.f32 %v2382_v63, 0.0 }
 0x2f3   : > { %v2334_v56 = vpop.f32.mrf.mxu2 }
 0x2f5   : > { %v2345_v49 = vpop.f32.mrf.mxu3  ;;  %v2435_v59 = vpop.f32.mrf.mxu0 }
 0x2f6   : > { %v2346_v9 = vadd.f32 %v2345_v49, %v2328_v61  ;;  %v2436_v38 = vadd.f32 %v2435_v59, %v1993_v33 }
 0x2f7   : > { %v2383_v1 = vpop.f32.mrf.mxu1 }
 0x2f8   : > { %v2384_v11 = vadd.f32 %v2383_v1, %v2366_v62  ;;  %v2462_v16 = vmax.f32 %v2346_v9, 0.0 }
 0x2fa   : > { %v2467_v6 = vmax.f32 %v2384_v11, 0.0 }
 0x2fb   : > { %v2399_v8 = vpop.f32.mrf.mxu2 }
 0x2fc   : > { %v2475_v34 = vpack.c.bf16 %v2467_v6, %v2463_v3  ;;  %v2400_v15 = vadd.f32 %v2399_v8, %v1992_v40 }
 0x2fd   : > { %v2347_v14 = vpop.f32.mrf.mxu3  ;;  %v2437_v4 = vpop.f32.mrf.mxu0 }
 0x2fe   : > { %v2348_v36 = vadd.f32 %v2347_v14, %v2330_v5  ;;  %2768 = vmatmul.bf16.vlgmr.msra.gmra.mxu3 %v2475_v34  ;;  %v2438_v43 = vadd.f32 %v2437_v4, %v1993_v33 }
 0x2ff   : > { %v2386_v41 = vpop.f32.mrf.mxu1 }
 0x300   : > { %v2466_v17 = vmax.f32 %v2348_v36, 0.0  ;;  %v2387_v22 = vadd.f32 %v2386_v41, %v2369_v20 }
 0x302   : > { %v2474_v21 = vpack.c.bf16 %v2466_v17, %v2462_v16  ;;  %v2471_v24 = vmax.f32 %v2387_v22, 0.0 }
 0x303   : > { %v2401_v10 = vpop.f32.mrf.mxu2 }
 0x304   : > { %2750 = vmatmul.bf16.vlgmr.msra.gmra.mxu2 %v2474_v21  ;;  %v2479_v28 = vpack.c.bf16 %v2471_v24, %v2471_v24  ;;  %v2402_v52 = vadd.f32 %v2401_v10, %v1992_v40 }
 0x305   : > { %v2350_v47 = vpop.f32.mrf.mxu3  ;;  %v2440_v18 = vpop.f32.mrf.mxu0 }
 0x306   : > { %v2351_v25 = vadd.f32 %v2350_v47, %v2333_v48  ;;  %v2441_v55 = vadd.f32 %v2440_v18, %v1993_v33 }
 0x307   : > { %v2388_v23 = vpop.f32.mrf.mxu1 }
 0x308   : > { %v2470_v31 = vmax.f32 %v2351_v25, 0.0 }
 0x30a   : > { %v2478_v35 = vpack.c.bf16 %v2470_v31, %v2470_v31 }
 0x30b   : > { %v2404_v26 = vpop.f32.mrf.mxu2 }
 0x30c   : > { %v2405_v60 = vadd.f32 %v2404_v26, %v1992_v40 }
 0x30d   : > { %v2352_v29 = vpop.f32.mrf.mxu3  ;;  %v2442_v30 = vpop.f32.mrf.mxu0 }
 0x30e   : > { %2773 = vmatmul.bf16.gmra.mxu3 %v2479_v28 }
 0x30f   : > { %v2453_v32 = vpop.f32.mrf.mxu1 }
 0x310   : > { %v2454_v44 = vadd.f32 %v2453_v32, %v2436_v38 }
 0x312   : > { %v2465_v27 = vmax.f32 %v2454_v44, 0.0 }
 0x313   : > { %v2406_v37 = vpop.f32.mrf.mxu2 }
 0x314   : > { %2755 = vmatmul.bf16.gmra.mxu2 %v2478_v35 }
 0x315   : > { %v2417_v39 = vpop.f32.mrf.mxu3 }
 0x316   : > { %v2418_v12 = vadd.f32 %v2417_v39, %v2400_v15 }
 0x317   : > { %v2455_v51 = vpop.f32.mrf.mxu1 }
 0x318   : > { %v2456_v45 = vadd.f32 %v2455_v51, %v2438_v43  ;;  %v2464_v57 = vmax.f32 %v2418_v12, 0.0 }
 0x31a   : > { %v2469_v46 = vmax.f32 %v2456_v45, 0.0 }
 0x31c   : > { %v2477_v53 = vpack.c.bf16 %v2469_v46, %v2465_v27 }
 0x31d   : > { %v2419_v54 = vpop.f32.mrf.mxu3 }
 0x31e   : > { %v2420_v42 = vadd.f32 %v2419_v54, %v2402_v52  ;;  %2804 = vmatmul.bf16.vlgmr.msrb.gmra.mxu1 %v2477_v53 }
 0x31f   : > { %v2458_v56 = vpop.f32.mrf.mxu1 }
 0x320   : > { %v2468_v58 = vmax.f32 %v2420_v42, 0.0  ;;  %v2459_v50 = vadd.f32 %v2458_v56, %v2441_v55 }
 0x322   : > { %v2476_v49 = vpack.c.bf16 %v2468_v58, %v2464_v57  ;;  %v2473_v59 = vmax.f32 %v2459_v50, 0.0 }
 0x324   : > { %v2481_v62 = vpack.c.bf16 %v2473_v59, %v2473_v59  ;;  %2786 = vmatmul.bf16.vlgmr.msrb.gmra.mxu0 %v2476_v49 }
 0x325   : > { %v2422_v63 = vpop.f32.mrf.mxu3 }
 0x326   : > { %v2423_v0 = vadd.f32 %v2422_v63, %v2405_v60  ;;  %2809 = vmatmul.bf16.vlgmr.msrb.gmra.mxu3 %v2481_v62 }
 0x327   : > { %v2460_v1 = vpop.f32.mrf.mxu1 }
 0x328   : > { %v2472_v11 = vmax.f32 %v2423_v0, 0.0 }
 0x32a   : > { %v2480_v2 = vpack.c.bf16 %v2472_v11, %v2472_v11 }
 0x32c   : > { %2791 = vmatmul.bf16.vlgmr.msrb.gmra.mxu2 %v2480_v2 }
 0x32d   : > { %v2424_v61 = vpop.f32.mrf.mxu3 }
 0x32e   : > { %4722 = shalt.err (!%p4719_p9)
}
 0x32f   : > { %s4825_s23 = smov 128   ;;  %s4826_s27 = smov 8  }
 0x330   : > { %4317 = dma.vmem_to_hbm [thread:$0]  (%p5011_p4), %s2836_s3, 384, %s2838_s24, %s2818_s21, %s4825_s23, %s4825_s23, %s4826_s27  }
 0x331   : > { %s5285_s17 = sld [smem:[#allocation34_spill]]  ;;  %s626_s3 = scalar_lea.vmem [#allocation18], %s5046_s1 }
 0x332   : > { %s5286_s12 = sld [smem:[#allocation36_spill]]  ;;  %s2852_s13 = sshll.u32 %s626_s3, 4  ;;  %s2853_s13 = int_to_ptr.vmem [resolvable:$true] %s2852_s13 }
 0x333   : > { %s2823_s28 = scalar_lea.sflag [#allocation19], %s5043_s2 }
 0x337   : > { %v4424_v34 = vld [vmem:[%s5285_s17] ss:$0 sm:$0xff] }
 0x338   : > { %s2851_s19 = scalar_lea.hbm %s5286_s12, %s4263_s25  ;;  %s4743_s7 = scalar_lea.hbm %s5286_s12, 48 }
 0x339   : > { %s2854_s1 = sshll.u32 %s2851_s19, 4  ;;  %s2855_s1 = int_to_ptr.hbm [resolvable:$true] %s2854_s1 }
 0x33a   : > { %s4737_s18 = sshra.s32 %s2855_s1, 4  ;;  %s4738_s18 = int_to_ptr.hbm [resolvable:$true] %s4737_s18 }
 0x33b   : > { %s4739_s20 = scalar_lea.hbm %s4738_s18, 24  ;;  %p4744_p0 = scmp.lt.s32.totalorder %s4738_s18, %s5286_s12 }
 0x33c   : > { %p4740_p10 = scmp.ne.s32.totalorder %s4738_s18, %s4739_s20  ;;  %p4745_p2 = scmp.lt.s32.totalorder %s4743_s7, %s4739_s20 }
 0x33e   : > { %p4741_p11 = pnand %p4740_p10, %p5011_p4  ;;  %p4746_p1 = por %p4745_p2, %p4744_p0 }
 0x340   : > { %p4742_p13 = pneg %p4741_p11 }
 0x342   : > { %p4747_p3 = pnand %p4746_p1, %p4742_p13 }
 0x381   : > { %v2769_v3 = vpop.f32.mrf.mxu3 }
 0x387   : > { %v2751_v6 = vpop.f32.mrf.mxu2 }
 0x388   : > { %v2752_v14 = vadd.f32 %v4424_v34, %v2751_v6 }
 0x389   : > { %v2771_v7 = vpop.f32.mrf.mxu3 }
 0x38a   : > { %v2770_v36 = vadd.f32 %v2769_v3, %v2752_v14 }
 0x38f   : > { %v2753_v8 = vpop.f32.mrf.mxu2 }
 0x390   : > { %v2754_v19 = vadd.f32 %v4424_v34, %v2753_v8 }
 0x391   : > { %v2774_v5 = vpop.f32.mrf.mxu3 }
 0x392   : > { %v2772_v21 = vadd.f32 %v2771_v7, %v2754_v19 }
 0x397   : > { %v2756_v9 = vpop.f32.mrf.mxu2 }
 0x398   : > { %v2757_v47 = vadd.f32 %v4424_v34, %v2756_v9 }
 0x399   : > { %v2776_v13 = vpop.f32.mrf.mxu3 }
 0x39a   : > { %v2775_v24 = vadd.f32 %v2774_v5, %v2757_v47 }
 0x39b   : > { %v2805_v41 = vpop.f32.mrf.mxu1 }
 0x39f   : > { %v2758_v4 = vpop.f32.mrf.mxu2 }
 0x3a1   : > { %v2787_v16 = vpop.f32.mrf.mxu0 }
 0x3a2   : > { %v2788_v17 = vadd.f32 %v2787_v16, %v2770_v36 }
 0x3a3   : > { %v2807_v23 = vpop.f32.mrf.mxu1 }
 0x3a4   : > { %v2806_v20 = vadd.f32 %v2805_v41, %v2788_v17 }
 0x3a6   : > { %2814 = vst [vmem:[%s626_s3] sm:$0xff] %v2806_v20 }
 0x3a9   : > { %v2789_v10 = vpop.f32.mrf.mxu0  ;;  %v2810_v22 = vpop.f32.mrf.mxu3 }
 0x3aa   : > { %v2790_v18 = vadd.f32 %v2789_v10, %v2772_v21 }
 0x3ac   : > { %v2808_v48 = vadd.f32 %v2807_v23, %v2790_v18 }
 0x3ae   : > { %2815 = vst [vmem:[%s626_s3 + $0x8] sm:$0xff] %v2808_v48 }
 0x3af   : > { %v2792_v25 = vpop.f32.mrf.mxu2 }
 0x3b0   : > { %v2793_v26 = vadd.f32 %v2792_v25, %v2775_v24 }
 0x3b1   : > { %v2812_v28 = vpop.f32.mrf.mxu3 }
 0x3b2   : > { %v2811_v29 = vadd.f32 %v2810_v22, %v2793_v26 }
 0x3b4   : > { %2816 = vst [vmem:[%s626_s3 + $0x10] sm:$0xff] %v2811_v29 }
 0x3b5   : > { %4750 = shalt.err (!%p4747_p3)
}
 0x3b6   : > { %4318 = dma.vmem_to_hbm [thread:$0]  (%p5011_p4), %s2853_s13, 384, %s2855_s1, %s2823_s28, %s4825_s23, %s4825_s23, %s4826_s27  }
 0x3b7   : > { %v2794_v30 = vpop.f32.mrf.mxu2 }
 0x3b8 PF: > { %s2869_s2 = sand.u32 1, %s4797_s29   ;;  %p5287_p5 = scmp.ge.s32.totalorder %s4809_s16, 2 }
 0x3b9   : > { %s2870_s3 = scalar_lea.sflag [#allocation4], %s2869_s2 }
 0x3ba   : > { %p4351_p12 = pnand %p5287_p5, %p5015_p6 }
 0x3bc   : > { %p4352_p7 = pneg %p4351_p12 }
 0x3be   : > { %4788 = dma.done.wait (%p4352_p7), %s2870_s3, 384  }
 0x3bf   : > { %4790 = vsyncadd (%p4352_p7), %s2870_s3, 4294966912  ;;  %s2880_s21 = scalar_lea.sflag [#allocation19], %s2869_s2 }
 0x3c0   : > { %4792 = dma.done.wait (%p4352_p7), %s2880_s21, 384  }
 0x3c1   : > { %4794 = vsyncadd (%p4352_p7), %s2880_s21, 4294966912  ;;  %p35_p4 = scmp.ge.s32.totalorder %s4989_s14, 4   ;;  %s5288_s29 = smov %s4801_s30 }
 0x3c2   : > { %s5289_s30 = smov %s4805_s15  ;;  %s5290_s15 = smov %s5000_s22 }
 0x3c3   : > { %s5291_s16 = smov %s4989_s14  ;;  %37 = sbr.rel (!%p35_p4) target bundleno = 22 (0x16), region = 166 }
 0x3c8   :  { %2886 = vsyncpa [#allocation3], 1 }
 0x3c9   :  { %2888 = vsyncpa [#allocation3 + $0x1], 1 }
 0x3ca   :  { %2889 = vsyncpa [#allocation6], 1 }
 0x3cb   :  { %2890 = vsyncpa [#allocation9], 1 }
 0x3cc   :  { %2891 = vsyncpa [#allocation12], 1 }
 0x3cd   :  { %2892 = vsyncpa [#allocation15], 1 }
 0x3ce   :  { %2893 = vsyncpa [#allocation4], 1 }
 0x3cf   :  { %2895 = vsyncpa [#allocation4 + $0x1], 1 }
 0x3d0   :  { %2896 = vsyncpa [#allocation19], 1 }
 0x3d1   :  { %2898 = vsyncpa [#allocation19 + $0x1], 1 }

</bundles_post_ra>
